<compile_context>
chip_gen: v5e
topology: v5e:2x2
jax: 0.10.0
libtpu: 0.0.40
codegen_flags: <defaults>
</compile_context>

<pallas_src>
import math

import jax
import jax.numpy as jnp
from jax.experimental import pallas as pl
from jax.experimental.pallas import tpu as pltpu

NUM_BINS = 21
SIGMA = 0.05
ALFA = 1.0 / math.sqrt(2.0 * math.pi * SIGMA ** 2)   # cancels in normalization
BETA = -1.0 / (2.0 * SIGMA ** 2)

# Sample points baked in as Python scalars (== torch.linspace(0, 1, 21)).
SAMPLE_POINTS = tuple(i / (NUM_BINS - 1) for i in range(NUM_BINS))


def _make_kernel(n_total: int, n_tile: int, needs_mask: bool, exp_in_bf16: bool):
    """Build the kernel body for a given (static) N tiling."""

    def kernel(data_ref, out_ref):
        # data_ref: (Bt, Nt, Ft) f32 tile.   out_ref: (Bt, NUM_BINS, Ft) f32,
        # resident across the N (reduction) grid axis.
        n_idx = pl.program_id(2)
        n_last = pl.num_programs(2) - 1

        data = data_ref[...]
        b_t, n_t, f_t = data.shape
        beta = jnp.float32(BETA)

        if needs_mask:
            # Ragged N tail: padded rows of the last block hold unspecified
            # bits.  Clamp them so exp() stays finite, and exclude them from
            # the sum by zeroing their entry in the MXU reduction vector.
            row3 = jax.lax.broadcasted_iota(jnp.int32, (b_t, n_t, f_t), 1)
            valid3 = (n_idx * n_tile + row3) < n_total
            data = jnp.where(valid3, data, jnp.float32(0.0))
            row1 = jax.lax.broadcasted_iota(jnp.int32, (b_t, 1, n_t), 2)
            red_vec = ((n_idx * n_tile + row1) < n_total).astype(jnp.float32)
        else:
            red_vec = jnp.ones((b_t, 1, n_t), dtype=jnp.float32)

        if exp_in_bf16:
            red_vec = red_vec.astype(jnp.bfloat16)   # 0/1 exact in bf16

        # 21 lane-dense EUP exps; per-bin instance reduction on the idle MXU.
        rows = []
        for k in range(NUM_BINS):
            diff = jnp.float32(SAMPLE_POINTS[k]) - data            # (Bt,Nt,Ft)
            arg = beta * (diff * diff)
            if exp_in_bf16:
                # Optional ~2x EUP throughput on v6e/v7x; NOT bit-matching f32.
                w = jnp.exp(arg.astype(jnp.bfloat16))
                dot_kwargs = {}
            else:
                w = jnp.exp(arg)                                   # f32 EUP exp
                dot_kwargs = dict(precision=jax.lax.Precision.HIGHEST)
            rows.append(jnp.einsum(
                "bmn,bnf->bmf", red_vec, w,
                preferred_element_type=jnp.float32, **dot_kwargs))  # (Bt,1,Ft)

        slab = jnp.concatenate(rows, axis=1)                       # (Bt,21,Ft)

        @pl.when(n_idx == 0)
        def _init():
            out_ref[...] = slab

        @pl.when(n_idx > 0)
        def _accumulate():
            out_ref[...] += slab                                   # single RMW/step

        @pl.when(n_idx == n_last)
        def _finalize():
            acc = out_ref[...]                                     # (Bt,21,Ft)
            norm = jnp.sum(acc, axis=1, keepdims=True)             # (Bt,1,Ft)
            # ALFA cancels here; norm == 0 -> NaN, matching the torch module.
            out_ref[...] = acc * pl.reciprocal(norm, approx=False)

    return kernel


def _largest_divisor_tile(full: int, max_tile: int, quantum: int) -> int:
    """Largest divisor of `full` that is a multiple of `quantum` and <= max_tile.
    Falls back to the full extent (a full-extent block is always legal)."""
    if full <= max_tile:
        return full
    t = (max_tile // quantum) * quantum
    while t >= quantum:
        if full % t == 0:
            return t
        t -= quantum
    return full


def _vmem_capacity_bytes() -> int:
    try:
        return int(pltpu.get_tpu_info().vmem_capacity_bytes)
    except Exception:
        return 64 * 1024 * 1024   # conservative (v7x-sized) fallback


def distribution_pooling_filter(data: jax.Array, *, exp_in_bf16: bool = False) -> jax.Array:
    """data: (B, N, F) -> (B, F, NUM_BINS) float32 (matches the torch module)."""
    assert data.ndim == 3
    B, N, F = data.shape
    data = data.astype(jnp.float32)

    big_vmem = _vmem_capacity_bytes() >= 100 * 1024 * 1024   # v5e/v6e 128 MiB parts

    # ---- tile selection ------------------------------------------------------
    # F tile: lane-dense, multiple of 128 whenever F can be split.
    f_tile = _largest_divisor_tile(F, 1024 if big_vmem else 512, 128)

    # N tile: one (1, Nt, Ft) slab of ~4 MiB (v5e/v6e) / ~2 MiB (v7x), multiple
    # of 8.  cdiv grid + in-kernel masking => never falls back to full extent.
    slab_budget = (4 if big_vmem else 2) * 1024 * 1024
    n_cap = max(8, ((slab_budget // 4) // max(f_tile, 1)) // 8 * 8)
    n_tile = N if N <= n_cap else n_cap
    grid_n = pl.cdiv(N, n_tile)
    needs_mask = (N % n_tile) != 0

    # B tile: pack batch elements to amortize the ~0.35 us/grid-step overhead.
    b_cap = max(1, slab_budget // (4 * n_tile * f_tile))
    b_tile = _largest_divisor_tile(B, b_cap, 1)

    # v7x has 2 TensorCores and only "parallel" axes shard across them: ensure
    # at least one parallel axis has extent >= 2 whenever the shape allows it.
    if (B // b_tile) * (F // f_tile) < 2:
        if B > 1:
            b_tile = _largest_divisor_tile(B, max(1, B // 2), 1)
        elif F % 128 == 0 and F >= 256:
            f_tile = _largest_divisor_tile(F, max(128, (F // 2) // 128 * 128), 128)
        # else: a single (b, f) tile; splitting further would need wrapper-side
        # partial sums over N (not worth it for this op).

    grid = (B // b_tile, F // f_tile, grid_n)

    # ---- VMEM budget (generation aware) --------------------------------------
    in_bytes = b_tile * n_tile * f_tile * 4
    out_bytes = b_tile * NUM_BINS * f_tile * 4
    vmem_ceiling = (64 if big_vmem else 48) * 1024 * 1024
    vmem_limit = int(min(vmem_ceiling,
                         max(24 * 1024 * 1024, 6 * (in_bytes + out_bytes))))

    cost = pl.CostEstimate(
        flops=5 * B * N * F * NUM_BINS + 2 * B * F * NUM_BINS,
        transcendentals=B * N * F * NUM_BINS,
        bytes_accessed=B * N * F * 4 + B * F * NUM_BINS * 4,
    )

    kernel = _make_kernel(N, n_tile, needs_mask, exp_in_bf16)

    out_bnf = pl.pallas_call(
        kernel,
        out_shape=jax.ShapeDtypeStruct((B, NUM_BINS, F), jnp.float32),
        grid_spec=pltpu.PrefetchScalarGridSpec(
            num_scalar_prefetch=0,
            grid=grid,
            in_specs=[
                pl.BlockSpec((b_tile, n_tile, f_tile), lambda b, f, n: (b, n, f)),
            ],
            out_specs=pl.BlockSpec((b_tile, NUM_BINS, f_tile),
                                   lambda b, f, n: (b, 0, f)),
        ),
        compiler_params=pltpu.CompilerParams(
            dimension_semantics=("parallel", "parallel", "arbitrary"),
            vmem_limit_bytes=vmem_limit,
        ),
        cost_estimate=cost,
    )(data)

    # Lane-dense kernel output (B, NUM_BINS, F) -> module layout (B, F, NUM_BINS).
    # (Drop this transpose if the consumer can take the (B, NUM_BINS, F) slab.)
    return jnp.transpose(out_bnf, (0, 2, 1))


def _reference(data: jax.Array) -> jax.Array:
    """Pure-JAX mirror of the PyTorch forward."""
    data = data.astype(jnp.float32)
    sp = jnp.asarray(SAMPLE_POINTS, dtype=jnp.float32)            # (NUM_BINS,)
    diff = sp[None, None, None, :] - data[..., None]              # (B,N,F,NB)
    result = jnp.float32(ALFA) * jnp.exp(jnp.float32(BETA) * diff * diff)
    out_unnormalized = jnp.sum(result, axis=1)                    # (B,F,NB)
    norm_coeff = jnp.sum(out_unnormalized, axis=2, keepdims=True) # (B,F,1)
    return out_unnormalized / norm_coeff


if __name__ == "__main__":
    key = jax.random.PRNGKey(0)
    B, N, F = 2, 8, 32  # batch, num_instances, num_features
    # Instance features roughly in [0, 1], like the sample-point range.
    data = jax.random.uniform(key, (B, N, F), dtype=jnp.float32)

    out = distribution_pooling_filter(data)
    out = jax.block_until_ready(out)

    ref = _reference(data)
    assert out.shape == (B, F, NUM_BINS), out.shape
    assert jnp.allclose(out, ref, atol=1e-5, rtol=1e-5), "mismatch vs reference"

    print("KERNEL_OK")
</pallas_src>

<mosaic_0001>
module attributes {stable_mosaic.version = 11 : i64} {
  func.func @kernel(%arg0: i32, %arg1: i32, %arg2: i32, %arg3: memref<1x8x32xf32, #tpu.memory_space<vmem>>, %arg4: memref<1x21x32xf32, #tpu.memory_space<vmem>>) attributes {dimension_semantics = [#tpu.dimension_semantics<parallel>, #tpu.dimension_semantics<parallel>, #tpu.dimension_semantics<arbitrary>], iteration_bounds = array<i64: 2, 1, 1>, scalar_prefetch = 0 : i64, scratch_operands = 0 : i64, tpu.core_type = #tpu.core_type<tc>, window_params = [{transform_indices = @transform_0, window_bounds = array<i64: 1, 8, 32>}, {transform_indices = @transform_1, window_bounds = array<i64: 1, 21, 32>}]} {
    %c0 = arith.constant 0 : index
    %c0_0 = arith.constant 0 : index
    %c0_1 = arith.constant 0 : index
    %0 = vector.load %arg3[%c0, %c0_0, %c0_1] : memref<1x8x32xf32, #tpu.memory_space<vmem>>, vector<1x8x32xf32>
    %cst = arith.constant 1.000000e+00 : f32
    %1 = vector.broadcast %cst : f32 to vector<1x1x8xf32>
    %cst_2 = arith.constant 0.000000e+00 : f32
    %2 = vector.broadcast %cst_2 : f32 to vector<1x8x32xf32>
    %3 = arith.subf %2, %0 : vector<1x8x32xf32>
    %4 = arith.mulf %3, %3 : vector<1x8x32xf32>
    %cst_3 = arith.constant -2.000000e+02 : f32
    %5 = vector.broadcast %cst_3 : f32 to vector<1x8x32xf32>
    %6 = arith.mulf %5, %4 : vector<1x8x32xf32>
    %7 = math.exp %6 : vector<1x8x32xf32>
    "tpu.trace_start"() <{level = 10 : i32, message = "bmn,bnf->bmf"}> : () -> ()
    %cst_4 = arith.constant dense<0.000000e+00> : vector<1x1x32xf32>
    %8 = tpu.matmul %1, %7, %cst_4 {dimension_numbers = #tpu.dot_dimension_numbers<[2], [1], [1], [2], [0, 0, 0, 1, 1, 2], [0], [0]>, precision = #tpu.contract_precision<fp32>} : vector<1x1x8xf32>, vector<1x8x32xf32>, vector<1x1x32xf32> -> vector<1x1x32xf32>
    "tpu.trace_stop"() : () -> ()
    %cst_5 = arith.constant 5.000000e-02 : f32
    %9 = vector.broadcast %cst_5 : f32 to vector<1x8x32xf32>
    %10 = arith.subf %9, %0 : vector<1x8x32xf32>
    %11 = arith.mulf %10, %10 : vector<1x8x32xf32>
    %cst_6 = arith.constant -2.000000e+02 : f32
    %12 = vector.broadcast %cst_6 : f32 to vector<1x8x32xf32>
    %13 = arith.mulf %12, %11 : vector<1x8x32xf32>
    %14 = math.exp %13 : vector<1x8x32xf32>
    "tpu.trace_start"() <{level = 10 : i32, message = "bmn,bnf->bmf"}> : () -> ()
    %cst_7 = arith.constant dense<0.000000e+00> : vector<1x1x32xf32>
    %15 = tpu.matmul %1, %14, %cst_7 {dimension_numbers = #tpu.dot_dimension_numbers<[2], [1], [1], [2], [0, 0, 0, 1, 1, 2], [0], [0]>, precision = #tpu.contract_precision<fp32>} : vector<1x1x8xf32>, vector<1x8x32xf32>, vector<1x1x32xf32> -> vector<1x1x32xf32>
    "tpu.trace_stop"() : () -> ()
    %cst_8 = arith.constant 1.000000e-01 : f32
    %16 = vector.broadcast %cst_8 : f32 to vector<1x8x32xf32>
    %17 = arith.subf %16, %0 : vector<1x8x32xf32>
    %18 = arith.mulf %17, %17 : vector<1x8x32xf32>
    %cst_9 = arith.constant -2.000000e+02 : f32
    %19 = vector.broadcast %cst_9 : f32 to vector<1x8x32xf32>
    %20 = arith.mulf %19, %18 : vector<1x8x32xf32>
    %21 = math.exp %20 : vector<1x8x32xf32>
    "tpu.trace_start"() <{level = 10 : i32, message = "bmn,bnf->bmf"}> : () -> ()
    %cst_10 = arith.constant dense<0.000000e+00> : vector<1x1x32xf32>
    %22 = tpu.matmul %1, %21, %cst_10 {dimension_numbers = #tpu.dot_dimension_numbers<[2], [1], [1], [2], [0, 0, 0, 1, 1, 2], [0], [0]>, precision = #tpu.contract_precision<fp32>} : vector<1x1x8xf32>, vector<1x8x32xf32>, vector<1x1x32xf32> -> vector<1x1x32xf32>
    "tpu.trace_stop"() : () -> ()
    %cst_11 = arith.constant 1.500000e-01 : f32
    %23 = vector.broadcast %cst_11 : f32 to vector<1x8x32xf32>
    %24 = arith.subf %23, %0 : vector<1x8x32xf32>
    %25 = arith.mulf %24, %24 : vector<1x8x32xf32>
    %cst_12 = arith.constant -2.000000e+02 : f32
    %26 = vector.broadcast %cst_12 : f32 to vector<1x8x32xf32>
    %27 = arith.mulf %26, %25 : vector<1x8x32xf32>
    %28 = math.exp %27 : vector<1x8x32xf32>
    "tpu.trace_start"() <{level = 10 : i32, message = "bmn,bnf->bmf"}> : () -> ()
    %cst_13 = arith.constant dense<0.000000e+00> : vector<1x1x32xf32>
    %29 = tpu.matmul %1, %28, %cst_13 {dimension_numbers = #tpu.dot_dimension_numbers<[2], [1], [1], [2], [0, 0, 0, 1, 1, 2], [0], [0]>, precision = #tpu.contract_precision<fp32>} : vector<1x1x8xf32>, vector<1x8x32xf32>, vector<1x1x32xf32> -> vector<1x1x32xf32>
    "tpu.trace_stop"() : () -> ()
    %cst_14 = arith.constant 2.000000e-01 : f32
    %30 = vector.broadcast %cst_14 : f32 to vector<1x8x32xf32>
    %31 = arith.subf %30, %0 : vector<1x8x32xf32>
    %32 = arith.mulf %31, %31 : vector<1x8x32xf32>
    %cst_15 = arith.constant -2.000000e+02 : f32
    %33 = vector.broadcast %cst_15 : f32 to vector<1x8x32xf32>
    %34 = arith.mulf %33, %32 : vector<1x8x32xf32>
    %35 = math.exp %34 : vector<1x8x32xf32>
    "tpu.trace_start"() <{level = 10 : i32, message = "bmn,bnf->bmf"}> : () -> ()
    %cst_16 = arith.constant dense<0.000000e+00> : vector<1x1x32xf32>
    %36 = tpu.matmul %1, %35, %cst_16 {dimension_numbers = #tpu.dot_dimension_numbers<[2], [1], [1], [2], [0, 0, 0, 1, 1, 2], [0], [0]>, precision = #tpu.contract_precision<fp32>} : vector<1x1x8xf32>, vector<1x8x32xf32>, vector<1x1x32xf32> -> vector<1x1x32xf32>
    "tpu.trace_stop"() : () -> ()
    %cst_17 = arith.constant 2.500000e-01 : f32
    %37 = vector.broadcast %cst_17 : f32 to vector<1x8x32xf32>
    %38 = arith.subf %37, %0 : vector<1x8x32xf32>
    %39 = arith.mulf %38, %38 : vector<1x8x32xf32>
    %cst_18 = arith.constant -2.000000e+02 : f32
    %40 = vector.broadcast %cst_18 : f32 to vector<1x8x32xf32>
    %41 = arith.mulf %40, %39 : vector<1x8x32xf32>
    %42 = math.exp %41 : vector<1x8x32xf32>
    "tpu.trace_start"() <{level = 10 : i32, message = "bmn,bnf->bmf"}> : () -> ()
    %cst_19 = arith.constant dense<0.000000e+00> : vector<1x1x32xf32>
    %43 = tpu.matmul %1, %42, %cst_19 {dimension_numbers = #tpu.dot_dimension_numbers<[2], [1], [1], [2], [0, 0, 0, 1, 1, 2], [0], [0]>, precision = #tpu.contract_precision<fp32>} : vector<1x1x8xf32>, vector<1x8x32xf32>, vector<1x1x32xf32> -> vector<1x1x32xf32>
    "tpu.trace_stop"() : () -> ()
    %cst_20 = arith.constant 3.000000e-01 : f32
    %44 = vector.broadcast %cst_20 : f32 to vector<1x8x32xf32>
    %45 = arith.subf %44, %0 : vector<1x8x32xf32>
    %46 = arith.mulf %45, %45 : vector<1x8x32xf32>
    %cst_21 = arith.constant -2.000000e+02 : f32
    %47 = vector.broadcast %cst_21 : f32 to vector<1x8x32xf32>
    %48 = arith.mulf %47, %46 : vector<1x8x32xf32>
    %49 = math.exp %48 : vector<1x8x32xf32>
    "tpu.trace_start"() <{level = 10 : i32, message = "bmn,bnf->bmf"}> : () -> ()
    %cst_22 = arith.constant dense<0.000000e+00> : vector<1x1x32xf32>
    %50 = tpu.matmul %1, %49, %cst_22 {dimension_numbers = #tpu.dot_dimension_numbers<[2], [1], [1], [2], [0, 0, 0, 1, 1, 2], [0], [0]>, precision = #tpu.contract_precision<fp32>} : vector<1x1x8xf32>, vector<1x8x32xf32>, vector<1x1x32xf32> -> vector<1x1x32xf32>
    "tpu.trace_stop"() : () -> ()
    %cst_23 = arith.constant 3.500000e-01 : f32
    %51 = vector.broadcast %cst_23 : f32 to vector<1x8x32xf32>
    %52 = arith.subf %51, %0 : vector<1x8x32xf32>
    %53 = arith.mulf %52, %52 : vector<1x8x32xf32>
    %cst_24 = arith.constant -2.000000e+02 : f32
    %54 = vector.broadcast %cst_24 : f32 to vector<1x8x32xf32>
    %55 = arith.mulf %54, %53 : vector<1x8x32xf32>
    %56 = math.exp %55 : vector<1x8x32xf32>
    "tpu.trace_start"() <{level = 10 : i32, message = "bmn,bnf->bmf"}> : () -> ()
    %cst_25 = arith.constant dense<0.000000e+00> : vector<1x1x32xf32>
    %57 = tpu.matmul %1, %56, %cst_25 {dimension_numbers = #tpu.dot_dimension_numbers<[2], [1], [1], [2], [0, 0, 0, 1, 1, 2], [0], [0]>, precision = #tpu.contract_precision<fp32>} : vector<1x1x8xf32>, vector<1x8x32xf32>, vector<1x1x32xf32> -> vector<1x1x32xf32>
    "tpu.trace_stop"() : () -> ()
    %cst_26 = arith.constant 4.000000e-01 : f32
    %58 = vector.broadcast %cst_26 : f32 to vector<1x8x32xf32>
    %59 = arith.subf %58, %0 : vector<1x8x32xf32>
    %60 = arith.mulf %59, %59 : vector<1x8x32xf32>
    %cst_27 = arith.constant -2.000000e+02 : f32
    %61 = vector.broadcast %cst_27 : f32 to vector<1x8x32xf32>
    %62 = arith.mulf %61, %60 : vector<1x8x32xf32>
    %63 = math.exp %62 : vector<1x8x32xf32>
    "tpu.trace_start"() <{level = 10 : i32, message = "bmn,bnf->bmf"}> : () -> ()
    %cst_28 = arith.constant dense<0.000000e+00> : vector<1x1x32xf32>
    %64 = tpu.matmul %1, %63, %cst_28 {dimension_numbers = #tpu.dot_dimension_numbers<[2], [1], [1], [2], [0, 0, 0, 1, 1, 2], [0], [0]>, precision = #tpu.contract_precision<fp32>} : vector<1x1x8xf32>, vector<1x8x32xf32>, vector<1x1x32xf32> -> vector<1x1x32xf32>
    "tpu.trace_stop"() : () -> ()
    %cst_29 = arith.constant 4.500000e-01 : f32
    %65 = vector.broadcast %cst_29 : f32 to vector<1x8x32xf32>
    %66 = arith.subf %65, %0 : vector<1x8x32xf32>
    %67 = arith.mulf %66, %66 : vector<1x8x32xf32>
    %cst_30 = arith.constant -2.000000e+02 : f32
    %68 = vector.broadcast %cst_30 : f32 to vector<1x8x32xf32>
    %69 = arith.mulf %68, %67 : vector<1x8x32xf32>
    %70 = math.exp %69 : vector<1x8x32xf32>
    "tpu.trace_start"() <{level = 10 : i32, message = "bmn,bnf->bmf"}> : () -> ()
    %cst_31 = arith.constant dense<0.000000e+00> : vector<1x1x32xf32>
    %71 = tpu.matmul %1, %70, %cst_31 {dimension_numbers = #tpu.dot_dimension_numbers<[2], [1], [1], [2], [0, 0, 0, 1, 1, 2], [0], [0]>, precision = #tpu.contract_precision<fp32>} : vector<1x1x8xf32>, vector<1x8x32xf32>, vector<1x1x32xf32> -> vector<1x1x32xf32>
    "tpu.trace_stop"() : () -> ()
    %cst_32 = arith.constant 5.000000e-01 : f32
    %72 = vector.broadcast %cst_32 : f32 to vector<1x8x32xf32>
    %73 = arith.subf %72, %0 : vector<1x8x32xf32>
    %74 = arith.mulf %73, %73 : vector<1x8x32xf32>
    %cst_33 = arith.constant -2.000000e+02 : f32
    %75 = vector.broadcast %cst_33 : f32 to vector<1x8x32xf32>
    %76 = arith.mulf %75, %74 : vector<1x8x32xf32>
    %77 = math.exp %76 : vector<1x8x32xf32>
    "tpu.trace_start"() <{level = 10 : i32, message = "bmn,bnf->bmf"}> : () -> ()
    %cst_34 = arith.constant dense<0.000000e+00> : vector<1x1x32xf32>
    %78 = tpu.matmul %1, %77, %cst_34 {dimension_numbers = #tpu.dot_dimension_numbers<[2], [1], [1], [2], [0, 0, 0, 1, 1, 2], [0], [0]>, precision = #tpu.contract_precision<fp32>} : vector<1x1x8xf32>, vector<1x8x32xf32>, vector<1x1x32xf32> -> vector<1x1x32xf32>
    "tpu.trace_stop"() : () -> ()
    %cst_35 = arith.constant 5.500000e-01 : f32
    %79 = vector.broadcast %cst_35 : f32 to vector<1x8x32xf32>
    %80 = arith.subf %79, %0 : vector<1x8x32xf32>
    %81 = arith.mulf %80, %80 : vector<1x8x32xf32>
    %cst_36 = arith.constant -2.000000e+02 : f32
    %82 = vector.broadcast %cst_36 : f32 to vector<1x8x32xf32>
    %83 = arith.mulf %82, %81 : vector<1x8x32xf32>
    %84 = math.exp %83 : vector<1x8x32xf32>
    "tpu.trace_start"() <{level = 10 : i32, message = "bmn,bnf->bmf"}> : () -> ()
    %cst_37 = arith.constant dense<0.000000e+00> : vector<1x1x32xf32>
    %85 = tpu.matmul %1, %84, %cst_37 {dimension_numbers = #tpu.dot_dimension_numbers<[2], [1], [1], [2], [0, 0, 0, 1, 1, 2], [0], [0]>, precision = #tpu.contract_precision<fp32>} : vector<1x1x8xf32>, vector<1x8x32xf32>, vector<1x1x32xf32> -> vector<1x1x32xf32>
    "tpu.trace_stop"() : () -> ()
    %cst_38 = arith.constant 6.000000e-01 : f32
    %86 = vector.broadcast %cst_38 : f32 to vector<1x8x32xf32>
    %87 = arith.subf %86, %0 : vector<1x8x32xf32>
    %88 = arith.mulf %87, %87 : vector<1x8x32xf32>
    %cst_39 = arith.constant -2.000000e+02 : f32
    %89 = vector.broadcast %cst_39 : f32 to vector<1x8x32xf32>
    %90 = arith.mulf %89, %88 : vector<1x8x32xf32>
    %91 = math.exp %90 : vector<1x8x32xf32>
    "tpu.trace_start"() <{level = 10 : i32, message = "bmn,bnf->bmf"}> : () -> ()
    %cst_40 = arith.constant dense<0.000000e+00> : vector<1x1x32xf32>
    %92 = tpu.matmul %1, %91, %cst_40 {dimension_numbers = #tpu.dot_dimension_numbers<[2], [1], [1], [2], [0, 0, 0, 1, 1, 2], [0], [0]>, precision = #tpu.contract_precision<fp32>} : vector<1x1x8xf32>, vector<1x8x32xf32>, vector<1x1x32xf32> -> vector<1x1x32xf32>
    "tpu.trace_stop"() : () -> ()
    %cst_41 = arith.constant 6.500000e-01 : f32
    %93 = vector.broadcast %cst_41 : f32 to vector<1x8x32xf32>
    %94 = arith.subf %93, %0 : vector<1x8x32xf32>
    %95 = arith.mulf %94, %94 : vector<1x8x32xf32>
    %cst_42 = arith.constant -2.000000e+02 : f32
    %96 = vector.broadcast %cst_42 : f32 to vector<1x8x32xf32>
    %97 = arith.mulf %96, %95 : vector<1x8x32xf32>
    %98 = math.exp %97 : vector<1x8x32xf32>
    "tpu.trace_start"() <{level = 10 : i32, message = "bmn,bnf->bmf"}> : () -> ()
    %cst_43 = arith.constant dense<0.000000e+00> : vector<1x1x32xf32>
    %99 = tpu.matmul %1, %98, %cst_43 {dimension_numbers = #tpu.dot_dimension_numbers<[2], [1], [1], [2], [0, 0, 0, 1, 1, 2], [0], [0]>, precision = #tpu.contract_precision<fp32>} : vector<1x1x8xf32>, vector<1x8x32xf32>, vector<1x1x32xf32> -> vector<1x1x32xf32>
    "tpu.trace_stop"() : () -> ()
    %cst_44 = arith.constant 0.699999988 : f32
    %100 = vector.broadcast %cst_44 : f32 to vector<1x8x32xf32>
    %101 = arith.subf %100, %0 : vector<1x8x32xf32>
    %102 = arith.mulf %101, %101 : vector<1x8x32xf32>
    %cst_45 = arith.constant -2.000000e+02 : f32
    %103 = vector.broadcast %cst_45 : f32 to vector<1x8x32xf32>
    %104 = arith.mulf %103, %102 : vector<1x8x32xf32>
    %105 = math.exp %104 : vector<1x8x32xf32>
    "tpu.trace_start"() <{level = 10 : i32, message = "bmn,bnf->bmf"}> : () -> ()
    %cst_46 = arith.constant dense<0.000000e+00> : vector<1x1x32xf32>
    %106 = tpu.matmul %1, %105, %cst_46 {dimension_numbers = #tpu.dot_dimension_numbers<[2], [1], [1], [2], [0, 0, 0, 1, 1, 2], [0], [0]>, precision = #tpu.contract_precision<fp32>} : vector<1x1x8xf32>, vector<1x8x32xf32>, vector<1x1x32xf32> -> vector<1x1x32xf32>
    "tpu.trace_stop"() : () -> ()
    %cst_47 = arith.constant 7.500000e-01 : f32
    %107 = vector.broadcast %cst_47 : f32 to vector<1x8x32xf32>
    %108 = arith.subf %107, %0 : vector<1x8x32xf32>
    %109 = arith.mulf %108, %108 : vector<1x8x32xf32>
    %cst_48 = arith.constant -2.000000e+02 : f32
    %110 = vector.broadcast %cst_48 : f32 to vector<1x8x32xf32>
    %111 = arith.mulf %110, %109 : vector<1x8x32xf32>
    %112 = math.exp %111 : vector<1x8x32xf32>
    "tpu.trace_start"() <{level = 10 : i32, message = "bmn,bnf->bmf"}> : () -> ()
    %cst_49 = arith.constant dense<0.000000e+00> : vector<1x1x32xf32>
    %113 = tpu.matmul %1, %112, %cst_49 {dimension_numbers = #tpu.dot_dimension_numbers<[2], [1], [1], [2], [0, 0, 0, 1, 1, 2], [0], [0]>, precision = #tpu.contract_precision<fp32>} : vector<1x1x8xf32>, vector<1x8x32xf32>, vector<1x1x32xf32> -> vector<1x1x32xf32>
    "tpu.trace_stop"() : () -> ()
    %cst_50 = arith.constant 8.000000e-01 : f32
    %114 = vector.broadcast %cst_50 : f32 to vector<1x8x32xf32>
    %115 = arith.subf %114, %0 : vector<1x8x32xf32>
    %116 = arith.mulf %115, %115 : vector<1x8x32xf32>
    %cst_51 = arith.constant -2.000000e+02 : f32
    %117 = vector.broadcast %cst_51 : f32 to vector<1x8x32xf32>
    %118 = arith.mulf %117, %116 : vector<1x8x32xf32>
    %119 = math.exp %118 : vector<1x8x32xf32>
    "tpu.trace_start"() <{level = 10 : i32, message = "bmn,bnf->bmf"}> : () -> ()
    %cst_52 = arith.constant dense<0.000000e+00> : vector<1x1x32xf32>
    %120 = tpu.matmul %1, %119, %cst_52 {dimension_numbers = #tpu.dot_dimension_numbers<[2], [1], [1], [2], [0, 0, 0, 1, 1, 2], [0], [0]>, precision = #tpu.contract_precision<fp32>} : vector<1x1x8xf32>, vector<1x8x32xf32>, vector<1x1x32xf32> -> vector<1x1x32xf32>
    "tpu.trace_stop"() : () -> ()
    %cst_53 = arith.constant 8.500000e-01 : f32
    %121 = vector.broadcast %cst_53 : f32 to vector<1x8x32xf32>
    %122 = arith.subf %121, %0 : vector<1x8x32xf32>
    %123 = arith.mulf %122, %122 : vector<1x8x32xf32>
    %cst_54 = arith.constant -2.000000e+02 : f32
    %124 = vector.broadcast %cst_54 : f32 to vector<1x8x32xf32>
    %125 = arith.mulf %124, %123 : vector<1x8x32xf32>
    %126 = math.exp %125 : vector<1x8x32xf32>
    "tpu.trace_start"() <{level = 10 : i32, message = "bmn,bnf->bmf"}> : () -> ()
    %cst_55 = arith.constant dense<0.000000e+00> : vector<1x1x32xf32>
    %127 = tpu.matmul %1, %126, %cst_55 {dimension_numbers = #tpu.dot_dimension_numbers<[2], [1], [1], [2], [0, 0, 0, 1, 1, 2], [0], [0]>, precision = #tpu.contract_precision<fp32>} : vector<1x1x8xf32>, vector<1x8x32xf32>, vector<1x1x32xf32> -> vector<1x1x32xf32>
    "tpu.trace_stop"() : () -> ()
    %cst_56 = arith.constant 0.899999976 : f32
    %128 = vector.broadcast %cst_56 : f32 to vector<1x8x32xf32>
    %129 = arith.subf %128, %0 : vector<1x8x32xf32>
    %130 = arith.mulf %129, %129 : vector<1x8x32xf32>
    %cst_57 = arith.constant -2.000000e+02 : f32
    %131 = vector.broadcast %cst_57 : f32 to vector<1x8x32xf32>
    %132 = arith.mulf %131, %130 : vector<1x8x32xf32>
    %133 = math.exp %132 : vector<1x8x32xf32>
    "tpu.trace_start"() <{level = 10 : i32, message = "bmn,bnf->bmf"}> : () -> ()
    %cst_58 = arith.constant dense<0.000000e+00> : vector<1x1x32xf32>
    %134 = tpu.matmul %1, %133, %cst_58 {dimension_numbers = #tpu.dot_dimension_numbers<[2], [1], [1], [2], [0, 0, 0, 1, 1, 2], [0], [0]>, precision = #tpu.contract_precision<fp32>} : vector<1x1x8xf32>, vector<1x8x32xf32>, vector<1x1x32xf32> -> vector<1x1x32xf32>
    "tpu.trace_stop"() : () -> ()
    %cst_59 = arith.constant 0.949999988 : f32
    %135 = vector.broadcast %cst_59 : f32 to vector<1x8x32xf32>
    %136 = arith.subf %135, %0 : vector<1x8x32xf32>
    %137 = arith.mulf %136, %136 : vector<1x8x32xf32>
    %cst_60 = arith.constant -2.000000e+02 : f32
    %138 = vector.broadcast %cst_60 : f32 to vector<1x8x32xf32>
    %139 = arith.mulf %138, %137 : vector<1x8x32xf32>
    %140 = math.exp %139 : vector<1x8x32xf32>
    "tpu.trace_start"() <{level = 10 : i32, message = "bmn,bnf->bmf"}> : () -> ()
    %cst_61 = arith.constant dense<0.000000e+00> : vector<1x1x32xf32>
    %141 = tpu.matmul %1, %140, %cst_61 {dimension_numbers = #tpu.dot_dimension_numbers<[2], [1], [1], [2], [0, 0, 0, 1, 1, 2], [0], [0]>, precision = #tpu.contract_precision<fp32>} : vector<1x1x8xf32>, vector<1x8x32xf32>, vector<1x1x32xf32> -> vector<1x1x32xf32>
    "tpu.trace_stop"() : () -> ()
    %cst_62 = arith.constant 1.000000e+00 : f32
    %142 = vector.broadcast %cst_62 : f32 to vector<1x8x32xf32>
    %143 = arith.subf %142, %0 : vector<1x8x32xf32>
    %144 = arith.mulf %143, %143 : vector<1x8x32xf32>
    %cst_63 = arith.constant -2.000000e+02 : f32
    %145 = vector.broadcast %cst_63 : f32 to vector<1x8x32xf32>
    %146 = arith.mulf %145, %144 : vector<1x8x32xf32>
    %147 = math.exp %146 : vector<1x8x32xf32>
    "tpu.trace_start"() <{level = 10 : i32, message = "bmn,bnf->bmf"}> : () -> ()
    %cst_64 = arith.constant dense<0.000000e+00> : vector<1x1x32xf32>
    %148 = tpu.matmul %1, %147, %cst_64 {dimension_numbers = #tpu.dot_dimension_numbers<[2], [1], [1], [2], [0, 0, 0, 1, 1, 2], [0], [0]>, precision = #tpu.contract_precision<fp32>} : vector<1x1x8xf32>, vector<1x8x32xf32>, vector<1x1x32xf32> -> vector<1x1x32xf32>
    "tpu.trace_stop"() : () -> ()
    %149 = tpu.concatenate %8, %15, %22, %29, %36, %43, %50, %57, %64, %71, %78, %85, %92, %99, %106, %113 in 1 : vector<1x1x32xf32>, vector<1x1x32xf32>, vector<1x1x32xf32>, vector<1x1x32xf32>, vector<1x1x32xf32>, vector<1x1x32xf32>, vector<1x1x32xf32>, vector<1x1x32xf32>, vector<1x1x32xf32>, vector<1x1x32xf32>, vector<1x1x32xf32>, vector<1x1x32xf32>, vector<1x1x32xf32>, vector<1x1x32xf32>, vector<1x1x32xf32>, vector<1x1x32xf32> -> vector<1x16x32xf32>
    %150 = tpu.concatenate %120, %127, %134, %141, %148 in 1 : vector<1x1x32xf32>, vector<1x1x32xf32>, vector<1x1x32xf32>, vector<1x1x32xf32>, vector<1x1x32xf32> -> vector<1x5x32xf32>
    %151 = tpu.concatenate %149, %150 in 1 : vector<1x16x32xf32>, vector<1x5x32xf32> -> vector<1x21x32xf32>
    %c0_i32 = arith.constant 0 : i32
    %152 = arith.cmpi eq, %arg2, %c0_i32 : i32
    %153 = arith.extui %152 : i1 to i32
    %c0_i32_65 = arith.constant 0 : i32
    %154 = arith.cmpi ne, %153, %c0_i32_65 : i32
    scf.if %154 {
      %c0_70 = arith.constant 0 : index
      %c0_71 = arith.constant 0 : index
      %c0_72 = arith.constant 0 : index
      %161 = vector.load %arg4[%c0_70, %c0_71, %c0_72] : memref<1x21x32xf32, #tpu.memory_space<vmem>>, vector<1x21x32xf32>
      tpu.vector_store %arg4[%c0_70, %c0_71, %c0_72], %151 {strides = array<i32>} : memref<1x21x32xf32, #tpu.memory_space<vmem>>, vector<1x21x32xf32>,
    } else {
    }
    %c0_i32_66 = arith.constant 0 : i32
    %155 = arith.cmpi sgt, %arg2, %c0_i32_66 : i32
    %156 = arith.extui %155 : i1 to i32
    %c0_i32_67 = arith.constant 0 : i32
    %157 = arith.cmpi ne, %156, %c0_i32_67 : i32
    scf.if %157 {
      %c0_70 = arith.constant 0 : index
      %c0_71 = arith.constant 0 : index
      %c0_72 = arith.constant 0 : index
      %161 = vector.load %arg4[%c0_70, %c0_71, %c0_72] : memref<1x21x32xf32, #tpu.memory_space<vmem>>, vector<1x21x32xf32>
      %162 = arith.addf %161, %151 : vector<1x21x32xf32>
      %c0_73 = arith.constant 0 : index
      %c0_74 = arith.constant 0 : index
      %c0_75 = arith.constant 0 : index
      %163 = vector.load %arg4[%c0_73, %c0_74, %c0_75] : memref<1x21x32xf32, #tpu.memory_space<vmem>>, vector<1x21x32xf32>
      tpu.vector_store %arg4[%c0_73, %c0_74, %c0_75], %162 {strides = array<i32>} : memref<1x21x32xf32, #tpu.memory_space<vmem>>, vector<1x21x32xf32>,
    } else {
    }
    %c0_i32_68 = arith.constant 0 : i32
    %158 = arith.cmpi eq, %arg2, %c0_i32_68 : i32
    %159 = arith.extui %158 : i1 to i32
    %c0_i32_69 = arith.constant 0 : i32
    %160 = arith.cmpi ne, %159, %c0_i32_69 : i32
    scf.if %160 {
      %c0_70 = arith.constant 0 : index
      %c0_71 = arith.constant 0 : index
      %c0_72 = arith.constant 0 : index
      %161 = vector.load %arg4[%c0_70, %c0_71, %c0_72] : memref<1x21x32xf32, #tpu.memory_space<vmem>>, vector<1x21x32xf32>
      %cst_73 = arith.constant dense<0.000000e+00> : vector<1x32xf32>
      %162 = vector.multi_reduction <add>, %161, %cst_73 [1] : vector<1x21x32xf32> to vector<1x32xf32>
      %163 = vector.shape_cast %162 : vector<1x32xf32> to vector<1x1x32xf32>
      %164 = tpu.reciprocal %163 : vector<1x1x32xf32> -> vector<1x1x32xf32>
      %165 = vector.broadcast %164 : vector<1x1x32xf32> to vector<1x21x32xf32>
      %166 = arith.mulf %161, %165 : vector<1x21x32xf32>
      %c0_74 = arith.constant 0 : index
      %c0_75 = arith.constant 0 : index
      %c0_76 = arith.constant 0 : index
      %167 = vector.load %arg4[%c0_74, %c0_75, %c0_76] : memref<1x21x32xf32, #tpu.memory_space<vmem>>, vector<1x21x32xf32>
      tpu.vector_store %arg4[%c0_74, %c0_75, %c0_76], %166 {strides = array<i32>} : memref<1x21x32xf32, #tpu.memory_space<vmem>>, vector<1x21x32xf32>,
    } else {
    }
    return
  }
  func.func @transform_0(%arg0: i32, %arg1: i32, %arg2: i32) -> (i32, i32, i32) {
    %c0_i32 = arith.constant 0 : i32
    return %arg0, %arg2, %arg1 : i32, i32, i32
  }
  func.func @transform_1(%arg0: i32, %arg1: i32, %arg2: i32) -> (i32, i32, i32) {
    %c0_i32 = arith.constant 0 : i32
    %c0_i32_0 = arith.constant 0 : i32
    return %arg0, %c0_i32, %arg1 : i32, i32, i32
  }
}

</mosaic_0001>

<bundles_post_ra>
// kernel: tpu_custom_call.1
= control target key start
LH: loop header
LB: loop body
LE: loop exit
PB: predicated region body
PF: predicated region fallthrough
CT: control target
= control target key end

     0   :  { %6 = vsyncpa [#allocation3], 0  ;;  %s4362_s0 = inlined_call_operand.hbm [shape: f32[2,8,32], index: 0, kind: input, shape index: {}]   ;;  %s4363_s1 = inlined_call_operand.vmem [shape: f32[2,21,32], index: 1, kind: output, shape index: {}]  }
   0x1   :  { %8 = vsyncpa [#allocation3 + $0x1], 0  ;;  %s3851_s6 = smov 0   ;;  %s3853_s7 = smov 0  }
   0x2   :  { %s3855_s8 = smov 0   ;;  %s3857_s9 = smov 0  }
   0x3   :  { %s3859_s10 = smov 0   ;;  %s3861_s11 = smov 0  }
   0x4 LB: > { %s3581_s12 = sadd.s32 4294967295, %s3837_s11   ;;  %s33_s13 = sadd.s32 1, %s3833_s10  ;;  %s3837_s11 = sphi %s3861_s11, %s14_s11   ;;  %s3833_s10 = sphi %s3859_s10, %s4370_s10   ;;  %s3829_s9 = sphi %s3857_s9, %s4369_s9   ;;  %s3825_s8 = sphi %s3855_s8, %s4368_s8   ;;  %s3821_s7 = sphi %s3853_s7, %s4367_s7   ;;  %s3817_s6 = sphi %s3851_s6, %s4366_s6  }
   0x5   : > { %p35_p0 = scmp.ge.s32.totalorder %s33_s13, 2  ;;  %s44_s14 = sadd.s32 1, %s3825_s8 }
   0x6   : > { %p51_p1 = scmp.ne.s32.totalorder %s3825_s8, %s3821_s7  ;;  %p52_p2 = scmp.eq.s32.totalorder %s3837_s11, 0 }
   0x7   : > { %s4372_s13 = smov (%p35_p0, %s33_s13), 0  ;;  %p57_p4 = scmp.ne.s32.totalorder %s3821_s7, %s3817_s6 }
   0x8   : > { %p3887_p3 = por %p52_p2, %p51_p1  ;;  %s37_s16 = ssub.s32 %s3833_s10, %s4372_s13 }
   0x9   : > { %p58_p5 = scmp.eq.s32.totalorder %s3581_s12, 0  ;;  %p42_p6 = scmp.eq.s32.totalorder %s37_s16, 0 }
   0xa   : > { %p3662_p8 = scmp.lt.s32.totalorder %s3837_s11, 2  ;;  %s109_s19 = sand.u32 1, %s3825_s8  }
   0xb   : > { %p3894_p7 = por %p58_p5, %p57_p4  ;;  %s3586_s20 = sshll.u32 %s3833_s10, 3 }
   0xc   : > { %s3900_s18 = scalar_select %p42_p6, %s3825_s8, %s44_s14  }
   0xd   : > { %s3585_s21 = sshll.u32 %s109_s19, 3  ;;  %s119_s24 = scalar_lea.hbm %s4362_s0, %s3586_s20 }
   0xe   : > { %s121_s25 = sshll.u32 %s119_s24, 4  ;;  %s113_s26 = scalar_lea.vmem [#allocation2], %s3585_s21  ;;  %s122_s25 = int_to_ptr.hbm [resolvable:$true] %s121_s25 }
   0xf   : > { %s123_s27 = sshll.u32 %s113_s26, 4  ;;  %p3659_p9 = pnand %p3662_p8, %p3887_p3  ;;  %s124_s27 = int_to_ptr.vmem [resolvable:$true] %s123_s27 }
  0x10   : > { %p3587_p10 = scmp.ge.s32.totalorder %s3837_s11, 1  ;;  %p128_p11 = scmp.lt.s32.totalorder %s3837_s11, 3 }
  0x11   : > { %s110_s28 = scalar_lea.sflag [#allocation3], %s109_s19 }
  0x12   : > { %3661 = dma.hbm_to_vmem [thread:$0]  (!%p3659_p9), %s122_s25, 128, %s124_s27, %s110_s28  }
  0x13   : > { %p129_p12 = pnand %p3587_p10, %p128_p11 }
  0x14   : > { %s134_s29 = sand.u32 (!%p129_p12), 1, %s3821_s7  }
  0x15   : > { %132 = sbr.rel (%p129_p12) target bundleno = 478 (0x1de), region = 24  ;;  %s3588_s30 = sshll.u32 (!%p129_p12), %s134_s29, 3 }
  0x16   : > { %s135_s2 = scalar_lea.sflag (!%p129_p12), [#allocation3], %s134_s29  ;;  %s138_s3 = scalar_lea.vmem (!%p129_p12), [#allocation2], %s3588_s30 }
  0x1a   : > { %3812 = dma.done.wait (%p3894_p7), %s135_s2, 128  }
  0x1b   : > { %3814 = vsyncadd (%p3894_p7), %s135_s2, 4294967168  ;;  %vm175_vm0 = vcmask 64512   ;;  %v3839_v0 = vmov 0   ;;  %v3917_v2 = vld [vmem:[%s138_s3] sm:$0xff]  ;;  %v3840_v48 = vmov 1.0   ;;  %vm3387_vm1 = vcmask 1040384  }
  0x1c   : > { %v177_v1 = vsel %vm175_vm0, 1.0, %v3839_v0  ;;  %v170_v3 = vsub.f32 0.0, %v3917_v2  ;;  %v325_v4 = vsub.f32 0.05, %v3917_v2  ;;  %v476_v5 = vsub.f32 0.1, %v3917_v2 }
  0x1d   : > { %v3922_v6 = vsub.f32 %v177_v1, %v177_v1  ;;  %v627_v7 = vsub.f32 0.15, %v3917_v2  ;;  %v778_v28 = vsub.f32 0.2, %v3917_v2  ;;  %v929_v38 = vsub.f32 0.25, %v3917_v2  ;;  %p161_p13 = scmp.lt.s32.totalorder %s3829_s9, 1 }
  0x1e   : > { %v171_v8 = vmul.f32 %v170_v3, %v170_v3  ;;  %v326_v9 = vmul.f32 %v325_v4, %v325_v4  ;;  %v477_v10 = vmul.f32 %v476_v5, %v476_v5  ;;  %v1080_v59 = vsub.f32 0.3, %v3917_v2 }
  0x1f   : > { %v628_v11 = vmul.f32 %v627_v7, %v627_v7  ;;  %v3926_v15 = vand.u32 4294901760, %v3922_v6  ;;  %v779_v34 = vmul.f32 %v778_v28, %v778_v28  ;;  %v930_v43 = vmul.f32 %v929_v38, %v929_v38  ;;  %s4374_s9 = smov (!%p161_p13, %s3829_s9), 1 }
  0x20   : > { %v172_v12 = vmul.f32 -200.0, %v171_v8  ;;  %v327_v13 = vmul.f32 -200.0, %v326_v9  ;;  %v478_v14 = vmul.f32 -200.0, %v477_v10  ;;  %v1081_v61 = vmul.f32 %v1080_v59, %v1080_v59  ;;  %s3655_s4 = smul.u32 24, %s4374_s9 }
  0x21   : > { %v629_v16 = vmul.f32 -200.0, %v628_v11  ;;  %v199_v21 = vsub.f32 %v3922_v6, %v3926_v15  ;;  %v780_v42 = vmul.f32 -200.0, %v779_v34  ;;  %v931_v47 = vmul.f32 -200.0, %v930_v43 }
  0x22   : > { %v173_v17 = vmul.f32 1.442695, %v172_v12  ;;  %v328_v18 = vmul.f32 1.442695, %v327_v13  ;;  %v479_v19 = vmul.f32 1.442695, %v478_v14  ;;  %s4289_s9 = scalar_lea.vmem %s4363_s1, %s3655_s4 }
  0x23   : > { %v630_v20 = vmul.f32 1.442695, %v629_v16  ;;  %v3930_v23 = vand.u32 4294901760, %v199_v21  ;;  %v781_v50 = vmul.f32 1.442695, %v780_v42  ;;  %v1082_v1 = vmul.f32 -200.0, %v1081_v61 }
  0x24   : > { %3713 = vpow2.f32 %v173_v17  ;;  %v932_v52 = vmul.f32 1.442695, %v931_v47  ;;  %v1231_v63 = vsub.f32 0.35, %v3917_v2  ;;  %v1835_v43 = vsub.f32 0.55, %v3917_v2 }
  0x25   : > { %3715 = vpow2.f32 %v328_v18  ;;  %v1083_v8 = vmul.f32 1.442695, %v1082_v1  ;;  %v1382_v18 = vsub.f32 0.4, %v3917_v2  ;;  %vm3389_vm2 = vcmask 1041408  }
  0x26   : > { %3717 = vpow2.f32 %v479_v19  ;;  %v1232_v3 = vmul.f32 %v1231_v63, %v1231_v63  ;;  %vm3391_vm3 = vcmask 1042432   ;;  %vm3393_vm4 = vcmask 1043456  }
  0x27   : > { %3719 = vpow2.f32 %v630_v20  ;;  %v1383_v20 = vmul.f32 %v1382_v18, %v1382_v18  ;;  %vm3395_vm5 = vcmask 1044480   ;;  %vm3397_vm6 = vcmask 1045504  }
  0x28   : > { %3721 = vpow2.f32 %v781_v50  ;;  %v1233_v5 = vmul.f32 -200.0, %v1232_v3  ;;  %vm3399_vm7 = vcmask 1046528   ;;  %vm3428_vm8 = vcmask 261120  }
  0x29   : > { %3723 = vpow2.f32 %v932_v52  ;;  %vm3431_vm9 = vcmask 258048  }
  0x2a   : > { %v3714_v22 = vpop.eup %3713  ;;  %v1234_v10 = vmul.f32 1.442695, %v1233_v5  ;;  %3725 = vpow2.f32 %v1083_v8 }
  0x2b   : > { %v3716_v24 = vpop.eup %3715  ;;  %v194_v25 = vand.u32 4294901760, %v3714_v22 }
  0x2c   : > { %v3718_v26 = vpop.eup %3717  ;;  %v345_v27 = vand.u32 4294901760, %v3716_v24  ;;  %3727 = vpow2.f32 %v1234_v10 }
  0x2d   : > { %v3720_v29 = vpop.eup %3719  ;;  %v221_v30 = vsub.f32 %v3714_v22, %v194_v25  ;;  %195 = vmatpush.msra.mxu0 %v194_v25  ;;  %271 = vmatpush.msra.mxu3 %v194_v25  ;;  %v496_v31 = vand.u32 4294901760, %v3718_v26  ;;  %v1533_v22 = vsub.f32 0.45, %v3917_v2 }
  0x2e   : > { %201 = vmatmul.f32.vlgmr.msra.gmra.mxu0 %v3930_v23  ;;  %275 = vmatmul.f32.vlgmr.msra.gmra.mxu3 %v3926_v15  ;;  %v372_v32 = vsub.f32 %v3716_v24, %v345_v27  ;;  %v3935_v33 = vand.u32 4294901760, %v3720_v29  ;;  %v3722_v56 = vpop.eup %3721 }
  0x2f   : > { %248 = vmatpush.msra.mxu2 %v221_v30  ;;  %v222_v35 = vand.u32 4294901760, %v221_v30  ;;  %v523_v36 = vsub.f32 %v3718_v26, %v496_v31  ;;  %v3724_v57 = vpop.eup %3723  ;;  %v798_v58 = vand.u32 4294901760, %v3722_v56  ;;  %v1534_v26 = vmul.f32 %v1533_v22, %v1533_v22 }
  0x30   : > { %251 = vmatmul.f32.vlgmr.msra.gmra.mxu2 %v3922_v6  ;;  %v373_v37 = vand.u32 4294901760, %v372_v32  ;;  %v674_v41 = vsub.f32 %v3720_v29, %v3935_v33  ;;  %v3957_v60 = vand.u32 4294901760, %v3724_v57  ;;  %v3726_v14 = vpop.eup %3725 }
  0x31   : > { %346 = vmatpush.msrb.mxu2 %v345_v27  ;;  %v223_v39 = vsub.f32 %v221_v30, %v222_v35  ;;  %297 = vmatpush.msrb.mxu0 %v222_v35  ;;  %v524_v45 = vand.u32 4294901760, %v523_v36  ;;  %v825_v62 = vsub.f32 %v3722_v56, %v798_v58  ;;  %v1100_v17 = vand.u32 4294901760, %v3726_v14 }
  0x32   : > { %v374_v40 = vsub.f32 %v372_v32, %v373_v37  ;;  %v675_v49 = vand.u32 4294901760, %v674_v41  ;;  %v976_v0 = vsub.f32 %v3724_v57, %v3957_v60  ;;  %v3728_v16 = vpop.eup %3727  ;;  %v1535_v28 = vmul.f32 -200.0, %v1534_v26 }
  0x33   : > { %448 = vmatpush.msra.mxu2 %v373_v37  ;;  %399 = vmatpush.msra.mxu0 %v372_v32  ;;  %v224_v44 = vand.u32 4294901760, %v223_v39  ;;  %v525_v51 = vsub.f32 %v523_v36, %v524_v45  ;;  %v826_v4 = vand.u32 4294901760, %v825_v62  ;;  %v3983_v19 = vand.u32 4294901760, %v3728_v16 }
  0x34   : > { %v375_v46 = vand.u32 4294901760, %v374_v40  ;;  %v676_v53 = vsub.f32 %v674_v41, %v675_v49  ;;  %v977_v7 = vand.u32 4294901760, %v976_v0  ;;  %v1127_v21 = vsub.f32 %v3726_v14, %v1100_v17 }
  0x35   : > { %225 = vmatpush.msra.mxu1 %v224_v44  ;;  %v526_v54 = vand.u32 4294901760, %v525_v51  ;;  %v827_v9 = vsub.f32 %v825_v62, %v826_v4  ;;  %v1278_v24 = vsub.f32 %v3728_v16, %v3983_v19  ;;  %v1536_v32 = vmul.f32 1.442695, %v1535_v28 }
  0x36   : > { %376 = vmatpush.msrb.mxu3 %v375_v46  ;;  %3590 = vmatmul.msk.f32.vlgmr.msra.gmra.mxu1 %vm175_vm0, %v3840_v48  ;;  %v677_v55 = vand.u32 4294901760, %v676_v53  ;;  %v978_v11 = vsub.f32 %v976_v0, %v977_v7  ;;  %v1684_v39 = vsub.f32 0.5, %v3917_v2  ;;  %v1836_v46 = vmul.f32 %v1835_v43, %v1835_v43 }
  0x37   : > { %319 = vmatpush.msrb.mxu1 %v194_v25  ;;  %3591 = vmatmul.msk.f32.vlgmr.msrb.gmra.mxu0 %vm175_vm0, %v3840_v48  ;;  %v828_v12 = vand.u32 4294901760, %v827_v9  ;;  %v1384_v25 = vmul.f32 -200.0, %v1383_v20  ;;  %v1279_v29 = vand.u32 4294901760, %v1278_v24 }
  0x38   : > { %352 = vmatmul.f32.vlgmr.msrb.gmra.mxu2 %v3930_v23  ;;  %3593 = vmatmul.msk.f32.vlgmr.msrb.gmra.mxu3 %vm175_vm0, %v3840_v48  ;;  %v979_v13 = vand.u32 4294901760, %v978_v11 }
  0x39   : > { %470 = vmatpush.msra.mxu3 %v345_v27  ;;  %422 = vmatpush.msra.mxu1 %v345_v27  ;;  %v1128_v27 = vand.u32 4294901760, %v1127_v21  ;;  %v1385_v30 = vmul.f32 1.442695, %v1384_v25 }
  0x3a   : > { %550 = vmatpush.msrb.mxu2 %v523_v36  ;;  %497 = vmatpush.msrb.mxu0 %v496_v31 }
  0x3b   : > { %573 = vmatpush.msrb.mxu3 %v496_v31  ;;  %3729 = vpow2.f32 %v1385_v30 }
  0x3c   : > { %3731 = vpow2.f32 %v1536_v32 }
  0x3e   : > { %3592 = vmatmul.msk.f32.vlgmr.msrb.gmra.mxu1 %vm175_vm0, %v3840_v48 }
  0x3f   : > { %402 = vmatmul.f32.vlgmr.msra.gmra.mxu0 %v3922_v6  ;;  %527 = vmatpush.msrb.mxu1 %v526_v54 }
  0x40   : > { %3594 = vmatmul.msk.f32.vlgmr.msra.gmra.mxu2 %vm175_vm0, %v3840_v48  ;;  %3595 = vmatmul.msk.f32.vlgmr.msra.gmra.mxu3 %vm175_vm0, %v3840_v48 }
  0x41   : > { %648 = vmatpush.msra.mxu2 %v3935_v33  ;;  %599 = vmatpush.msra.mxu0 %v524_v45  ;;  %v3730_v36 = vpop.eup %3729 }
  0x42   : > { %678 = vmatpush.msra.mxu3 %v677_v55  ;;  %v3732_v37 = vpop.eup %3731  ;;  %v1402_v38 = vand.u32 4294901760, %v3730_v36 }
  0x43   : > { %v4009_v40 = vand.u32 4294901760, %v3732_v37 }
  0x44   : > { %v1429_v42 = vsub.f32 %v3730_v36, %v1402_v38 }
  0x45   : > { %v1580_v44 = vsub.f32 %v3732_v37, %v4009_v40 }
  0x46   : > { %426 = vmatmul.f32.vlgmr.msra.gmra.mxu1 %v3926_v15  ;;  %v1430_v47 = vand.u32 4294901760, %v1429_v42 }
  0x47   : > { %503 = vmatmul.f32.vlgmr.msrb.gmra.mxu0 %v3930_v23  ;;  %621 = vmatpush.msra.mxu1 %v496_v31  ;;  %v1129_v31 = vsub.f32 %v1127_v21, %v1128_v27  ;;  %v1581_v50 = vand.u32 4294901760, %v1580_v44 }
  0x48   : > { %553 = vmatmul.f32.vlgmr.msrb.gmra.mxu2 %v3922_v6  ;;  %577 = vmatmul.f32.vlgmr.msrb.gmra.mxu3 %v3926_v15  ;;  %v1431_v52 = vsub.f32 %v1429_v42, %v1430_v47 }
  0x49   : > { %750 = vmatpush.msrb.mxu2 %v675_v49  ;;  %701 = vmatpush.msrb.mxu0 %v674_v41  ;;  %v1130_v34 = vand.u32 4294901760, %v1129_v31  ;;  %v1685_v41 = vmul.f32 %v1684_v39, %v1684_v39  ;;  %v1837_v49 = vmul.f32 -200.0, %v1836_v46  ;;  %v1582_v54 = vsub.f32 %v1580_v44, %v1581_v50 }
  0x4a   : > { %772 = vmatpush.msrb.mxu3 %v3935_v33  ;;  %v1432_v55 = vand.u32 4294901760, %v1431_v52 }
  0x4b   : > { %v1686_v45 = vmul.f32 -200.0, %v1685_v41  ;;  %v1838_v53 = vmul.f32 1.442695, %v1837_v49  ;;  %v1583_v56 = vand.u32 4294901760, %v1582_v54  ;;  %v2590_v54 = vsub.f32 0.8, %v3917_v2 }
  0x4d   : > { %v1687_v51 = vmul.f32 1.442695, %v1686_v45 }
  0x4e   : > { %3596 = vmatmul.msk.f32.vlgmr.msrb.gmra.mxu1 %vm175_vm0, %v3840_v48 }
  0x4f   : > { %3597 = vmatmul.msk.f32.vlgmr.msra.gmra.mxu0 %vm175_vm0, %v3840_v48  ;;  %724 = vmatpush.msrb.mxu1 %v3935_v33  ;;  %v1280_v33 = vsub.f32 %v1278_v24, %v1279_v29  ;;  %3733 = vpow2.f32 %v1687_v51 }
  0x50   : > { %654 = vmatmul.f32.vlgmr.msra.gmra.mxu2 %v3930_v23  ;;  %3599 = vmatmul.msk.f32.vlgmr.msra.gmra.mxu3 %vm175_vm0, %v3840_v48  ;;  %3735 = vpow2.f32 %v1838_v53 }
  0x51   : > { %852 = vmatpush.msra.mxu2 %v825_v62  ;;  %799 = vmatpush.msra.mxu0 %v798_v58  ;;  %v1281_v35 = vand.u32 4294901760, %v1280_v33 }
  0x52   : > { %875 = vmatpush.msra.mxu3 %v798_v58 }
  0x55   : > { %v3734_v57 = vpop.eup %3733 }
  0x56   : > { %3598 = vmatmul.msk.f32.vlgmr.msra.gmra.mxu1 %vm175_vm0, %v3840_v48  ;;  %v1704_v59 = vand.u32 4294901760, %v3734_v57 }
  0x57   : > { %704 = vmatmul.f32.vlgmr.msrb.gmra.mxu0 %v3922_v6  ;;  %829 = vmatpush.msra.mxu1 %v828_v12 }
  0x58   : > { %3600 = vmatmul.msk.f32.vlgmr.msrb.gmra.mxu2 %vm175_vm0, %v3840_v48  ;;  %3601 = vmatmul.msk.f32.vlgmr.msrb.gmra.mxu3 %vm175_vm0, %v3840_v48  ;;  %v1731_v63 = vsub.f32 %v3734_v57, %v1704_v59  ;;  %v2591_v57 = vmul.f32 %v2590_v54, %v2590_v54 }
  0x59   : > { %950 = vmatpush.msrb.mxu2 %v3957_v60  ;;  %901 = vmatpush.msrb.mxu0 %v826_v4 }
  0x5a   : > { %980 = vmatpush.msrb.mxu3 %v979_v13  ;;  %v1732_v5 = vand.u32 4294901760, %v1731_v63 }
  0x5c   : > { %v1733_v10 = vsub.f32 %v1731_v63, %v1732_v5 }
  0x5e   : > { %728 = vmatmul.f32.vlgmr.msrb.gmra.mxu1 %v3926_v15  ;;  %v1734_v13 = vand.u32 4294901760, %v1733_v10 }
  0x5f   : > { %805 = vmatmul.f32.vlgmr.msra.gmra.mxu0 %v3930_v23  ;;  %923 = vmatpush.msrb.mxu1 %v798_v58  ;;  %v3736_v58 = vpop.eup %3735 }
  0x60   : > { %855 = vmatmul.f32.vlgmr.msra.gmra.mxu2 %v3922_v6  ;;  %879 = vmatmul.f32.vlgmr.msra.gmra.mxu3 %v3926_v15  ;;  %v4035_v61 = vand.u32 4294901760, %v3736_v58 }
  0x61   : > { %1052 = vmatpush.msra.mxu2 %v977_v7  ;;  %1003 = vmatpush.msra.mxu0 %v976_v0  ;;  %v2137_v0 = vsub.f32 0.65, %v3917_v2 }
  0x62   : > { %1074 = vmatpush.msra.mxu3 %v3957_v60  ;;  %v1882_v1 = vsub.f32 %v3736_v58, %v4035_v61 }
  0x63   : > { %v2138_v4 = vmul.f32 %v2137_v0, %v2137_v0 }
  0x64   : > { %v1883_v8 = vand.u32 4294901760, %v1882_v1 }
  0x65   : > { %v2139_v7 = vmul.f32 -200.0, %v2138_v4 }
  0x66   : > { %3602 = vmatmul.msk.f32.vlgmr.msra.gmra.mxu1 %vm175_vm0, %v3840_v48  ;;  %v1884_v12 = vsub.f32 %v1882_v1, %v1883_v8 }
  0x67   : > { %3603 = vmatmul.msk.f32.vlgmr.msrb.gmra.mxu0 %vm175_vm0, %v3840_v48  ;;  %1026 = vmatpush.msra.mxu1 %v3957_v60  ;;  %v1986_v60 = vsub.f32 0.6, %v3917_v2  ;;  %v2140_v11 = vmul.f32 1.442695, %v2139_v7 }
  0x68   : > { %956 = vmatmul.f32.vlgmr.msrb.gmra.mxu2 %v3930_v23  ;;  %3605 = vmatmul.msk.f32.vlgmr.msrb.gmra.mxu3 %vm175_vm0, %v3840_v48  ;;  %v1885_v14 = vand.u32 4294901760, %v1884_v12 }
  0x69   : > { %1154 = vmatpush.msrb.mxu2 %v1127_v21  ;;  %1101 = vmatpush.msrb.mxu0 %v1100_v17  ;;  %v1987_v62 = vmul.f32 %v1986_v60, %v1986_v60  ;;  %v2741_v60 = vsub.f32 0.85, %v3917_v2 }
  0x6a   : > { %1177 = vmatpush.msrb.mxu3 %v1100_v17 }
  0x6b   : > { %v1988_v3 = vmul.f32 -200.0, %v1987_v62  ;;  %v2592_v62 = vmul.f32 -200.0, %v2591_v57 }
  0x6d   : > { %v1989_v9 = vmul.f32 1.442695, %v1988_v3 }
  0x6e   : > { %3604 = vmatmul.msk.f32.vlgmr.msrb.gmra.mxu1 %vm175_vm0, %v3840_v48 }
  0x6f   : > { %1006 = vmatmul.f32.vlgmr.msra.gmra.mxu0 %v3922_v6  ;;  %1131 = vmatpush.msrb.mxu1 %v1130_v34  ;;  %3737 = vpow2.f32 %v1989_v9 }
  0x70   : > { %3606 = vmatmul.msk.f32.vlgmr.msra.gmra.mxu2 %vm175_vm0, %v3840_v48  ;;  %3607 = vmatmul.msk.f32.vlgmr.msra.gmra.mxu3 %vm175_vm0, %v3840_v48  ;;  %3739 = vpow2.f32 %v2140_v11  ;;  %v2593_v11 = vmul.f32 1.442695, %v2592_v62 }
  0x71   : > { %1252 = vmatpush.msra.mxu2 %v3983_v19  ;;  %1203 = vmatpush.msra.mxu0 %v1128_v27 }
  0x72   : > { %1282 = vmatpush.msra.mxu3 %v1281_v35 }
  0x75   : > { %v3738_v16 = vpop.eup %3737 }
  0x76   : > { %1030 = vmatmul.f32.vlgmr.msra.gmra.mxu1 %v3926_v15  ;;  %v4059_v18 = vand.u32 4294901760, %v3738_v16 }
  0x77   : > { %1107 = vmatmul.f32.vlgmr.msrb.gmra.mxu0 %v3930_v23  ;;  %1225 = vmatpush.msra.mxu1 %v1100_v17  ;;  %v3740_v17 = vpop.eup %3739 }
  0x78   : > { %1157 = vmatmul.f32.vlgmr.msrb.gmra.mxu2 %v3922_v6  ;;  %1181 = vmatmul.f32.vlgmr.msrb.gmra.mxu3 %v3926_v15  ;;  %v4063_v20 = vand.u32 4294901760, %v3740_v17  ;;  %v2033_v22 = vsub.f32 %v3738_v16, %v4059_v18 }
  0x79   : > { %1354 = vmatpush.msrb.mxu2 %v1279_v29  ;;  %1305 = vmatpush.msrb.mxu0 %v1278_v24  ;;  %v2439_v24 = vsub.f32 0.75, %v3917_v2 }
  0x7a   : > { %1376 = vmatpush.msrb.mxu3 %v3983_v19  ;;  %v2184_v25 = vsub.f32 %v3740_v17, %v4063_v20  ;;  %v2034_v29 = vand.u32 4294901760, %v2033_v22 }
  0x7b   : > { %v2440_v27 = vmul.f32 %v2439_v24, %v2439_v24 }
  0x7c   : > { %v2185_v31 = vand.u32 4294901760, %v2184_v25  ;;  %v2035_v33 = vsub.f32 %v2033_v22, %v2034_v29 }
  0x7d   : > { %v2441_v30 = vmul.f32 -200.0, %v2440_v27 }
  0x7e   : > { %3608 = vmatmul.msk.f32.vlgmr.msrb.gmra.mxu1 %vm175_vm0, %v3840_v48  ;;  %v2186_v36 = vsub.f32 %v2184_v25, %v2185_v31  ;;  %v2036_v39 = vand.u32 4294901760, %v2035_v33 }
  0x7f   : > { %3609 = vmatmul.msk.f32.vlgmr.msra.gmra.mxu0 %vm175_vm0, %v3840_v48  ;;  %1328 = vmatpush.msrb.mxu1 %v3983_v19  ;;  %v2288_v19 = vsub.f32 0.7, %v3917_v2  ;;  %v2442_v34 = vmul.f32 1.442695, %v2441_v30 }
  0x80   : > { %1258 = vmatmul.f32.vlgmr.msra.gmra.mxu2 %v3930_v23  ;;  %3611 = vmatmul.msk.f32.vlgmr.msra.gmra.mxu3 %vm175_vm0, %v3840_v48  ;;  %v2187_v43 = vand.u32 4294901760, %v2186_v36 }
  0x81   : > { %1456 = vmatpush.msra.mxu2 %v1429_v42  ;;  %1403 = vmatpush.msra.mxu0 %v1402_v38  ;;  %v2289_v21 = vmul.f32 %v2288_v19, %v2288_v19 }
  0x82   : > { %1479 = vmatpush.msra.mxu3 %v1402_v38 }
  0x83   : > { %v2290_v26 = vmul.f32 -200.0, %v2289_v21 }
  0x85   : > { %v2291_v32 = vmul.f32 1.442695, %v2290_v26 }
  0x86   : > { %3610 = vmatmul.msk.f32.vlgmr.msra.gmra.mxu1 %vm175_vm0, %v3840_v48 }
  0x87   : > { %1308 = vmatmul.f32.vlgmr.msrb.gmra.mxu0 %v3922_v6  ;;  %1433 = vmatpush.msra.mxu1 %v1432_v55  ;;  %3741 = vpow2.f32 %v2291_v32 }
  0x88   : > { %3612 = vmatmul.msk.f32.vlgmr.msrb.gmra.mxu2 %vm175_vm0, %v3840_v48  ;;  %3613 = vmatmul.msk.f32.vlgmr.msrb.gmra.mxu3 %vm175_vm0, %v3840_v48  ;;  %3743 = vpow2.f32 %v2442_v34  ;;  %v2892_v34 = vsub.f32 0.9, %v3917_v2 }
  0x89   : > { %1554 = vmatpush.msrb.mxu2 %v4009_v40  ;;  %1505 = vmatpush.msrb.mxu0 %v1430_v47  ;;  %3745 = vpow2.f32 %v2593_v11 }
  0x8a   : > { %1584 = vmatpush.msrb.mxu3 %v1583_v56  ;;  %v2893_v36 = vmul.f32 %v2892_v34, %v2892_v34 }
  0x8e   : > { %1332 = vmatmul.f32.vlgmr.msrb.gmra.mxu1 %v3926_v15 }
  0x8f   : > { %1409 = vmatmul.f32.vlgmr.msra.gmra.mxu0 %v3930_v23  ;;  %1527 = vmatpush.msrb.mxu1 %v1402_v38 }
  0x90   : > { %1459 = vmatmul.f32.vlgmr.msra.gmra.mxu2 %v3922_v6  ;;  %1483 = vmatmul.f32.vlgmr.msra.gmra.mxu3 %v3926_v15 }
  0x91   : > { %1656 = vmatpush.msra.mxu2 %v1581_v50  ;;  %1607 = vmatpush.msra.mxu0 %v1580_v44  ;;  %v3742_v44 = vpop.eup %3741 }
  0x92   : > { %1678 = vmatpush.msra.mxu3 %v4009_v40  ;;  %v3744_v47 = vpop.eup %3743  ;;  %v4090_v51 = vand.u32 4294901760, %v3742_v44 }
  0x93   : > { %v4094_v56 = vand.u32 4294901760, %v3744_v47  ;;  %v3746_v27 = vpop.eup %3745 }
  0x96   : > { %3614 = vmatmul.msk.f32.vlgmr.msra.gmra.mxu1 %vm175_vm0, %v3840_v48 }
  0x97   : > { %3615 = vmatmul.msk.f32.vlgmr.msrb.gmra.mxu0 %vm175_vm0, %v3840_v48  ;;  %1630 = vmatpush.msra.mxu1 %v4009_v40 }
  0x98   : > { %1560 = vmatmul.f32.vlgmr.msrb.gmra.mxu2 %v3930_v23  ;;  %3617 = vmatmul.msk.f32.vlgmr.msrb.gmra.mxu3 %vm175_vm0, %v3840_v48 }
  0x99   : > { %1758 = vmatpush.msrb.mxu2 %v1731_v63  ;;  %1705 = vmatpush.msrb.mxu0 %v1704_v59  ;;  %v2742_v63 = vmul.f32 %v2741_v60, %v2741_v60 }
  0x9a   : > { %1781 = vmatpush.msrb.mxu3 %v1704_v59 }
  0x9e   : > { %3616 = vmatmul.msk.f32.vlgmr.msrb.gmra.mxu1 %vm175_vm0, %v3840_v48 }
  0x9f   : > { %1610 = vmatmul.f32.vlgmr.msra.gmra.mxu0 %v3922_v6  ;;  %1735 = vmatpush.msrb.mxu1 %v1734_v13 }
  0xa0   : > { %3618 = vmatmul.msk.f32.vlgmr.msra.gmra.mxu2 %vm175_vm0, %v3840_v48  ;;  %3619 = vmatmul.msk.f32.vlgmr.msra.gmra.mxu3 %vm175_vm0, %v3840_v48 }
  0xa1   : > { %1856 = vmatpush.msra.mxu2 %v4035_v61  ;;  %1807 = vmatpush.msra.mxu0 %v1732_v5 }
  0xa2   : > { %1886 = vmatpush.msra.mxu3 %v1885_v14 }
  0xa6   : > { %1634 = vmatmul.f32.vlgmr.msra.gmra.mxu1 %v3926_v15 }
  0xa7   : > { %1711 = vmatmul.f32.vlgmr.msrb.gmra.mxu0 %v3930_v23  ;;  %1829 = vmatpush.msra.mxu1 %v1704_v59  ;;  %v2335_v59 = vsub.f32 %v3742_v44, %v4090_v51 }
  0xa8   : > { %1761 = vmatmul.f32.vlgmr.msrb.gmra.mxu2 %v3922_v6  ;;  %1785 = vmatmul.f32.vlgmr.msrb.gmra.mxu3 %v3926_v15 }
  0xa9   : > { %1958 = vmatpush.msrb.mxu2 %v1883_v8  ;;  %1909 = vmatpush.msrb.mxu0 %v1882_v1  ;;  %v2336_v3 = vand.u32 4294901760, %v2335_v59  ;;  %v2743_v8 = vmul.f32 -200.0, %v2742_v63 }
  0xaa   : > { %1980 = vmatpush.msrb.mxu3 %v4035_v61 }
  0xab   : > { %v202_v28 = vpop.f32.mrf.mxu0  ;;  %v2337_v12 = vsub.f32 %v2335_v59, %v2336_v3  ;;  %v2744_v14 = vmul.f32 1.442695, %v2743_v8 }
  0xad   : > { %v2338_v21 = vand.u32 4294901760, %v2337_v12  ;;  %3747 = vpow2.f32 %v2744_v14 }
  0xae   : > { %3620 = vmatmul.msk.f32.vlgmr.msrb.gmra.mxu1 %vm175_vm0, %v3840_v48 }
  0xaf   : > { %3621 = vmatmul.msk.f32.vlgmr.msra.gmra.mxu0 %vm175_vm0, %v3840_v48  ;;  %1932 = vmatpush.msrb.mxu1 %v4035_v61  ;;  %v2486_v61 = vsub.f32 %v3744_v47, %v4094_v56 }
  0xb0   : > { %1862 = vmatmul.f32.vlgmr.msra.gmra.mxu2 %v3930_v23  ;;  %3623 = vmatmul.msk.f32.vlgmr.msra.gmra.mxu3 %vm175_vm0, %v3840_v48 }
  0xb1   : > { %2060 = vmatpush.msra.mxu2 %v2033_v22  ;;  %2007 = vmatpush.msra.mxu0 %v4059_v18  ;;  %v276_v35 = vpop.f32.mrf.mxu3  ;;  %v2487_v10 = vand.u32 4294901760, %v2486_v61 }
  0xb2   : > { %2083 = vmatpush.msra.mxu3 %v4059_v18 }
  0xb3   : > { %v228_v37 = vpop.f32.mrf.mxu1  ;;  %v252_v38 = vpop.f32.mrf.mxu2 }
  0xb4   : > { %v229_v40 = vadd.f32 %v228_v37, %v202_v28  ;;  %v300_v41 = vpop.f32.mrf.mxu0  ;;  %v3748_v28 = vpop.eup %3747 }
  0xb6   : > { %v253_v42 = vadd.f32 %v252_v38, %v229_v40  ;;  %3622 = vmatmul.msk.f32.vlgmr.msra.gmra.mxu1 %vm175_vm0, %v3840_v48  ;;  %v3043_v38 = vsub.f32 0.95, %v3917_v2  ;;  %v2894_v40 = vmul.f32 -200.0, %v2893_v36 }
  0xb7   : > { %1912 = vmatmul.f32.vlgmr.msrb.gmra.mxu0 %v3922_v6  ;;  %2037 = vmatpush.msra.mxu1 %v2036_v39 }
  0xb8   : > { %v277_v45 = vadd.f32 %v276_v35, %v253_v42  ;;  %3624 = vmatmul.msk.f32.vlgmr.msrb.gmra.mxu2 %vm175_vm0, %v3840_v48  ;;  %3625 = vmatmul.msk.f32.vlgmr.msrb.gmra.mxu3 %vm175_vm0, %v3840_v48  ;;  %v4147_v35 = vand.u32 4294901760, %v3748_v28 }
  0xb9   : > { %2158 = vmatpush.msrb.mxu2 %v4063_v20  ;;  %2109 = vmatpush.msrb.mxu0 %v2034_v29 }
  0xba   : > { %v301_v46 = vadd.f32 %v300_v41, %v277_v45  ;;  %2188 = vmatpush.msrb.mxu3 %v2187_v43  ;;  %v2788_v39 = vsub.f32 %v3748_v28, %v4147_v35  ;;  %v3044_v41 = vmul.f32 %v3043_v38, %v3043_v38 }
  0xbb   : > { %v322_v49 = vpop.f32.mrf.mxu1  ;;  %v353_v50 = vpop.f32.mrf.mxu2 }
  0xbc   : > { %v379_v52 = vpop.f32.mrf.mxu3  ;;  %v403_v53 = vpop.f32.mrf.mxu0  ;;  %v323_v16 = vadd.f32 %v322_v49, %v301_v46  ;;  %v3045_v47 = vmul.f32 -200.0, %v3044_v41  ;;  %v2789_v49 = vand.u32 4294901760, %v2788_v39 }
  0xbd   : > { %v380_v55 = vadd.f32 %v379_v52, %v353_v50  ;;  %v2895_v50 = vmul.f32 1.442695, %v2894_v40 }
  0xbe   : > { %1936 = vmatmul.f32.vlgmr.msrb.gmra.mxu1 %v3926_v15  ;;  %v3046_v52 = vmul.f32 1.442695, %v3045_v47 }
  0xbf   : > { %v404_v58 = vadd.f32 %v403_v53, %v380_v55  ;;  %2013 = vmatmul.f32.vlgmr.msra.gmra.mxu0 %v3930_v23  ;;  %2131 = vmatpush.msrb.mxu1 %v4059_v18  ;;  %v2488_v18 = vsub.f32 %v2486_v61, %v2487_v10  ;;  %v2790_v53 = vsub.f32 %v2788_v39, %v2789_v49  ;;  %3749 = vpow2.f32 %v2895_v50 }
  0xc0   : > { %2063 = vmatmul.f32.vlgmr.msra.gmra.mxu2 %v3922_v6  ;;  %2087 = vmatmul.f32.vlgmr.msra.gmra.mxu3 %v3926_v15  ;;  %3751 = vpow2.f32 %v3046_v52 }
  0xc1   : > { %2260 = vmatpush.msra.mxu2 %v2185_v31  ;;  %2211 = vmatpush.msra.mxu0 %v2184_v25  ;;  %v2489_v26 = vand.u32 4294901760, %v2488_v18  ;;  %v4139_v31 = vand.u32 4294901760, %v3746_v27 }
  0xc2   : > { %2282 = vmatpush.msra.mxu3 %v4063_v20 }
  0xc3   : > { %v427_v0 = vpop.f32.mrf.mxu1  ;;  %v451_v1 = vpop.f32.mrf.mxu2  ;;  %v2637_v37 = vsub.f32 %v3746_v27, %v4139_v31 }
  0xc4   : > { %v428_v4 = vadd.f32 %v427_v0, %v404_v58  ;;  %v473_v5 = vpop.f32.mrf.mxu3  ;;  %v4104_v7 = vpop.f32.mrf.mxu0 }
  0xc5   : > { %v2638_v44 = vand.u32 4294901760, %v2637_v37  ;;  %v3750_v60 = vpop.eup %3749 }
  0xc6   : > { %v452_v9 = vadd.f32 %v451_v1, %v428_v4  ;;  %3626 = vmatmul.msk.f32.vlgmr.msra.gmra.mxu1 %vm175_vm0, %v3840_v48  ;;  %v4191_v0 = vand.u32 4294901760, %v3750_v60  ;;  %v3194_v4 = vsub.f32 1.0, %v3917_v2 }
  0xc7   : > { %3627 = vmatmul.msk.f32.vlgmr.msrb.gmra.mxu0 %vm175_vm0, %v3840_v48  ;;  %2234 = vmatpush.msra.mxu1 %v4063_v20 }
  0xc8   : > { %v474_v13 = vadd.f32 %v473_v5, %v452_v9  ;;  %2164 = vmatmul.f32.vlgmr.msrb.gmra.mxu2 %v3930_v23  ;;  %3629 = vmatmul.msk.f32.vlgmr.msrb.gmra.mxu3 %vm175_vm0, %v3840_v48  ;;  %v3195_v8 = vmul.f32 %v3194_v4, %v3194_v4  ;;  %v2939_v9 = vsub.f32 %v3750_v60, %v4191_v0 }
  0xc9   : > { %2362 = vmatpush.msrb.mxu2 %v2335_v59  ;;  %2309 = vmatpush.msrb.mxu0 %v4090_v51  ;;  %v2791_v59 = vand.u32 4294901760, %v2790_v53 }
  0xca   : > { %v3346_v17 = vrot.slane %v474_v13, 7  ;;  %2385 = vmatpush.msrb.mxu3 %v4090_v51  ;;  %v2940_v13 = vand.u32 4294901760, %v2939_v9 }
  0xcb   : > { %v4116_v19 = vpop.f32.mrf.mxu1  ;;  %v4118_v20 = vpop.f32.mrf.mxu2 }
  0xcc   : > { %v4121_v22 = vsel %vm3387_vm1, %v323_v16, %v3346_v17  ;;  %v4123_v24 = vpop.f32.mrf.mxu3  ;;  %v4125_v25 = vpop.f32.mrf.mxu0 }
  0xce   : > { %3628 = vmatmul.msk.f32.vlgmr.msrb.gmra.mxu1 %vm175_vm0, %v3840_v48 }
  0xcf   : > { %2214 = vmatmul.f32.vlgmr.msra.gmra.mxu0 %v3922_v6  ;;  %2339 = vmatpush.msrb.mxu1 %v2338_v21  ;;  %v531_v21 = vadd.f32 %v4116_v19, %v4104_v7 }
  0xd0   : > { %3630 = vmatmul.msk.f32.vlgmr.msra.gmra.mxu2 %vm175_vm0, %v3840_v48  ;;  %3631 = vmatmul.msk.f32.vlgmr.msra.gmra.mxu3 %vm175_vm0, %v3840_v48 }
  0xd1   : > { %2460 = vmatpush.msra.mxu2 %v4094_v56  ;;  %2411 = vmatpush.msra.mxu0 %v2336_v3  ;;  %v555_v19 = vadd.f32 %v4118_v20, %v531_v21 }
  0xd2   : > { %2490 = vmatpush.msra.mxu3 %v2489_v26  ;;  %v2941_v26 = vsub.f32 %v2939_v9, %v2940_v13 }
  0xd3   : > { %v4135_v29 = vpop.f32.mrf.mxu1  ;;  %v4137_v30 = vpop.f32.mrf.mxu2  ;;  %v579_v41 = vadd.f32 %v4123_v24, %v555_v19 }
  0xd4   : > { %v4141_v32 = vpop.f32.mrf.mxu3  ;;  %v4143_v33 = vpop.f32.mrf.mxu0 }
  0xd5   : > { %v682_v28 = vadd.f32 %v4141_v32, %v4137_v30 }
  0xd6   : > { %2238 = vmatmul.f32.vlgmr.msra.gmra.mxu1 %v3926_v15 }
  0xd7   : > { %2315 = vmatmul.f32.vlgmr.msrb.gmra.mxu0 %v3930_v23  ;;  %2433 = vmatpush.msra.mxu1 %v4090_v51  ;;  %v2639_v51 = vsub.f32 %v2637_v37, %v2638_v44  ;;  %v706_v30 = vadd.f32 %v4143_v33, %v682_v28 }
  0xd8   : > { %2365 = vmatmul.f32.vlgmr.msrb.gmra.mxu2 %v3922_v6  ;;  %2389 = vmatmul.f32.vlgmr.msrb.gmra.mxu3 %v3926_v15 }
  0xd9   : > { %2562 = vmatpush.msrb.mxu2 %v2487_v10  ;;  %2513 = vmatpush.msrb.mxu0 %v2486_v61  ;;  %v2640_v57 = vand.u32 4294901760, %v2639_v51  ;;  %v3752_v61 = vpop.eup %3751  ;;  %v3196_v10 = vmul.f32 -200.0, %v3195_v8 }
  0xda   : > { %2584 = vmatpush.msrb.mxu3 %v4094_v56  ;;  %v4195_v5 = vand.u32 4294901760, %v3752_v61 }
  0xdb   : > { %v4157_v42 = vpop.f32.mrf.mxu1  ;;  %v4159_v43 = vpop.f32.mrf.mxu2  ;;  %v3197_v18 = vmul.f32 1.442695, %v3196_v10 }
  0xdc   : > { %v4161_v45 = vpop.f32.mrf.mxu3  ;;  %v4163_v46 = vpop.f32.mrf.mxu0  ;;  %v4204_v2 = vsub.f32 %v3752_v61, %v4195_v5 }
  0xdd   : > { %3753 = vpow2.f32 %v3197_v18 }
  0xde   : > { %3632 = vmatmul.msk.f32.vlgmr.msrb.gmra.mxu1 %vm175_vm0, %v3840_v48  ;;  %v3091_v17 = vand.u32 4294901760, %v4204_v2 }
  0xdf   : > { %3633 = vmatmul.msk.f32.vlgmr.msra.gmra.mxu0 %vm175_vm0, %v3840_v48  ;;  %2536 = vmatpush.msrb.mxu1 %v4094_v56 }
  0xe0   : > { %2466 = vmatmul.f32.vlgmr.msra.gmra.mxu2 %v3930_v23  ;;  %3635 = vmatmul.msk.f32.vlgmr.msra.gmra.mxu3 %vm175_vm0, %v3840_v48  ;;  %v3092_v7 = vsub.f32 %v4204_v2, %v3091_v17 }
  0xe1   : > { %2664 = vmatpush.msra.mxu2 %v2637_v37  ;;  %2611 = vmatpush.msra.mxu0 %v4139_v31 }
  0xe2   : > { %2687 = vmatpush.msra.mxu3 %v4139_v31  ;;  %v3093_v32 = vand.u32 4294901760, %v3092_v7 }
  0xe3   : > { %v832_v54 = vpop.f32.mrf.mxu1  ;;  %v4175_v55 = vpop.f32.mrf.mxu2 }
  0xe4   : > { %v4177_v58 = vpop.f32.mrf.mxu3  ;;  %v4179_v56 = vpop.f32.mrf.mxu0  ;;  %v833_v27 = vadd.f32 %v832_v54, %v4163_v46  ;;  %v730_v46 = vadd.f32 %v4157_v42, %v706_v30 }
  0xe5   : > { %v3754_v20 = vpop.eup %3753 }
  0xe6   : > { %3634 = vmatmul.msk.f32.vlgmr.msra.gmra.mxu1 %vm175_vm0, %v3840_v48  ;;  %v857_v40 = vadd.f32 %v4175_v55, %v833_v27  ;;  %v4242_v52 = vand.u32 4294901760, %v3754_v20  ;;  %v754_v53 = vadd.f32 %v4159_v43, %v730_v46 }
  0xe7   : > { %2516 = vmatmul.f32.vlgmr.msrb.gmra.mxu0 %v3922_v6  ;;  %2641 = vmatpush.msra.mxu1 %v2640_v57 }
  0xe8   : > { %3636 = vmatmul.msk.f32.vlgmr.msrb.gmra.mxu2 %vm175_vm0, %v3840_v48  ;;  %3637 = vmatmul.msk.f32.vlgmr.msrb.gmra.mxu3 %vm175_vm0, %v3840_v48  ;;  %v881_v33 = vadd.f32 %v4177_v58, %v857_v40  ;;  %v4252_v43 = vsub.f32 %v3754_v20, %v4242_v52  ;;  %v776_v61 = vadd.f32 %v4161_v45, %v754_v53 }
  0xe9   : > { %2762 = vmatpush.msrb.mxu2 %v4147_v35  ;;  %2713 = vmatpush.msrb.mxu0 %v2638_v44 }
  0xea   : > { %2792 = vmatpush.msrb.mxu3 %v2791_v59  ;;  %v905_v57 = vadd.f32 %v4179_v56, %v881_v33  ;;  %v3352_v4 = vrot.slane %v776_v61, 5 }
  0xeb   : > { %v4189_v62 = vpop.f32.mrf.mxu1  ;;  %v957_v63 = vpop.f32.mrf.mxu2 }
  0xec   : > { %v983_v1 = vpop.f32.mrf.mxu3  ;;  %v1007_v3 = vpop.f32.mrf.mxu0  ;;  %v927_v56 = vadd.f32 %v4189_v62, %v905_v57  ;;  %v3242_v62 = vand.u32 4294901760, %v4252_v43 }
  0xed   : > { %v984_v36 = vadd.f32 %v983_v1, %v957_v63 }
  0xee   : > { %2540 = vmatmul.f32.vlgmr.msrb.gmra.mxu1 %v3926_v15  ;;  %v3355_v10 = vrot.slane %v927_v56, 4 }
  0xef   : > { %2617 = vmatmul.f32.vlgmr.msra.gmra.mxu0 %v3930_v23  ;;  %2735 = vmatpush.msrb.mxu1 %v4139_v31  ;;  %v1008_v47 = vadd.f32 %v1007_v3, %v984_v36 }
  0xf0   : > { %2667 = vmatmul.f32.vlgmr.msra.gmra.mxu2 %v3922_v6  ;;  %2691 = vmatmul.f32.vlgmr.msra.gmra.mxu3 %v3926_v15 }
  0xf1   : > { %2864 = vmatpush.msra.mxu2 %v2789_v49  ;;  %2815 = vmatpush.msra.mxu0 %v2788_v39  ;;  %v603_v49 = vadd.f32 %v4125_v25, %v579_v41 }
  0xf2   : > { %2886 = vmatpush.msra.mxu3 %v4147_v35 }
  0xf3   : > { %v1031_v11 = vpop.f32.mrf.mxu1  ;;  %v1055_v12 = vpop.f32.mrf.mxu2  ;;  %v625_v25 = vadd.f32 %v4135_v29, %v603_v49 }
  0xf4   : > { %v4206_v14 = vpop.f32.mrf.mxu3  ;;  %v1108_v16 = vpop.f32.mrf.mxu0  ;;  %v1032_v24 = vadd.f32 %v1031_v11, %v1008_v47 }
  0xf5   : > { %v3349_v45 = vrot.slane %v625_v25, 6 }
  0xf6   : > { %3638 = vmatmul.msk.f32.vlgmr.msra.gmra.mxu1 %vm175_vm0, %v3840_v48  ;;  %v1056_v58 = vadd.f32 %v1055_v12, %v1032_v24 }
  0xf7   : > { %3639 = vmatmul.msk.f32.vlgmr.msrb.gmra.mxu0 %vm175_vm0, %v3840_v48  ;;  %2838 = vmatpush.msra.mxu1 %v4147_v35  ;;  %v2942_v35 = vand.u32 4294901760, %v2941_v26 }
  0xf8   : > { %2768 = vmatmul.f32.vlgmr.msrb.gmra.mxu2 %v3930_v23  ;;  %3641 = vmatmul.msk.f32.vlgmr.msrb.gmra.mxu3 %vm175_vm0, %v3840_v48  ;;  %v1078_v29 = vadd.f32 %v4206_v14, %v1056_v58 }
  0xf9   : > { %2966 = vmatpush.msrb.mxu2 %v2939_v9  ;;  %2913 = vmatpush.msrb.mxu0 %v4191_v0 }
  0xfa   : > { %2989 = vmatpush.msrb.mxu3 %v4191_v0  ;;  %v3358_v11 = vrot.slane %v1078_v29, 3 }
  0xfb   : > { %v1134_v31 = vpop.f32.mrf.mxu1  ;;  %v1158_v34 = vpop.f32.mrf.mxu2 }
  0xfc   : > { %v1135_v37 = vadd.f32 %v1134_v31, %v1108_v16  ;;  %v1182_v38 = vpop.f32.mrf.mxu3  ;;  %v1206_v39 = vpop.f32.mrf.mxu0  ;;  %v3243_v16 = vsub.f32 %v4252_v43, %v3242_v62 }
  0xfe   : > { %3640 = vmatmul.msk.f32.vlgmr.msrb.gmra.mxu1 %vm175_vm0, %v3840_v48  ;;  %v1159_v44 = vadd.f32 %v1158_v34, %v1135_v37  ;;  %v3244_v7 = vand.u32 4294901760, %v3243_v16 }
  0xff   : > { %2818 = vmatmul.f32.vlgmr.msra.gmra.mxu0 %v3922_v6  ;;  %2943 = vmatpush.msrb.mxu1 %v2942_v35 }
 0x100   : > { %3642 = vmatmul.msk.f32.vlgmr.msra.gmra.mxu2 %vm175_vm0, %v3840_v48  ;;  %3643 = vmatmul.msk.f32.vlgmr.msra.gmra.mxu3 %vm175_vm0, %v3840_v48  ;;  %v1183_v50 = vadd.f32 %v1182_v38, %v1159_v44 }
 0x101   : > { %3064 = vmatpush.msra.mxu2 %v4195_v5  ;;  %3015 = vmatpush.msra.mxu0 %v2940_v13  ;;  %v3390_v13 = vsel %vm3389_vm2, %v4121_v22, %v3349_v45 }
 0x102   : > { %3094 = vmatpush.msra.mxu3 %v3093_v32  ;;  %v1207_v60 = vadd.f32 %v1206_v39, %v1183_v50 }
 0x103   : > { %v1228_v51 = vpop.f32.mrf.mxu1  ;;  %v1259_v42 = vpop.f32.mrf.mxu2 }
 0x104   : > { %v1285_v54 = vpop.f32.mrf.mxu3  ;;  %v1309_v55 = vpop.f32.mrf.mxu0 }
 0x105   : > { %v1286_v59 = vadd.f32 %v1285_v54, %v1259_v42 }
 0x106   : > { %2842 = vmatmul.f32.vlgmr.msra.gmra.mxu1 %v3926_v15 }
 0x107   : > { %2919 = vmatmul.f32.vlgmr.msrb.gmra.mxu0 %v3930_v23  ;;  %3037 = vmatpush.msra.mxu1 %v4191_v0  ;;  %v1310_v63 = vadd.f32 %v1309_v55, %v1286_v59  ;;  %v1229_v0 = vadd.f32 %v1228_v51, %v1207_v60 }
 0x108   : > { %2969 = vmatmul.f32.vlgmr.msrb.gmra.mxu2 %v3922_v6  ;;  %2993 = vmatmul.f32.vlgmr.msrb.gmra.mxu3 %v3926_v15 }
 0x109   : > { %3166 = vmatpush.msrb.mxu2 %v3091_v17  ;;  %3117 = vmatpush.msrb.mxu0 %v4204_v2  ;;  %v3361_v14 = vrot.slane %v1229_v0, 2  ;;  %v3392_v17 = vsel %vm3391_vm3, %v3390_v13, %v3352_v4 }
 0x10a   : > { %3188 = vmatpush.msrb.mxu3 %v4195_v5  ;;  %v3394_v22 = vsel %vm3393_vm4, %v3392_v17, %v3355_v10 }
 0x10b   : > { %v1333_v1 = vpop.f32.mrf.mxu1  ;;  %v1357_v3 = vpop.f32.mrf.mxu2 }
 0x10c   : > { %v1334_v8 = vadd.f32 %v1333_v1, %v1310_v63  ;;  %v1379_v9 = vpop.f32.mrf.mxu3  ;;  %v1410_v2 = vpop.f32.mrf.mxu0 }
 0x10e   : > { %v1358_v12 = vadd.f32 %v1357_v3, %v1334_v8  ;;  %3644 = vmatmul.msk.f32.vlgmr.msrb.gmra.mxu1 %vm175_vm0, %v3840_v48 }
 0x10f   : > { %3645 = vmatmul.msk.f32.vlgmr.msra.gmra.mxu0 %vm175_vm0, %v3840_v48  ;;  %3140 = vmatpush.msrb.mxu1 %v4195_v5  ;;  %v3396_v5 = vsel %vm3395_vm5, %v3394_v22, %v3358_v11 }
 0x110   : > { %v1380_v18 = vadd.f32 %v1379_v9, %v1358_v12  ;;  %3070 = vmatmul.f32.vlgmr.msra.gmra.mxu2 %v3930_v23  ;;  %3647 = vmatmul.msk.f32.vlgmr.msra.gmra.mxu3 %vm175_vm0, %v3840_v48  ;;  %v3398_v26 = vsel %vm3397_vm6, %v3396_v5, %v3361_v14 }
 0x111   : > { %3268 = vmatpush.msra.mxu2 %v4252_v43  ;;  %3215 = vmatpush.msra.mxu0 %v4242_v52 }
 0x112   : > { %v3364_v21 = vrot.slane %v1380_v18, 1  ;;  %3291 = vmatpush.msra.mxu3 %v4242_v52 }
 0x113   : > { %v1436_v27 = vpop.f32.mrf.mxu1  ;;  %v1460_v28 = vpop.f32.mrf.mxu2 }
 0x114   : > { %v3400_v19 = vsel %vm3399_vm7, %v3398_v26, %v3364_v21  ;;  %v1437_v31 = vadd.f32 %v1436_v27, %v1410_v2  ;;  %v1484_v34 = vpop.f32.mrf.mxu3  ;;  %v1508_v35 = vpop.f32.mrf.mxu0 }
 0x115   : > { %3429 = vst.msk [vmem:[%s4289_s9] sm:$0xff] %vm3428_vm8, %v3400_v19 }
 0x116   : > { %v1461_v36 = vadd.f32 %v1460_v28, %v1437_v31  ;;  %3646 = vmatmul.msk.f32.vlgmr.msra.gmra.mxu1 %vm175_vm0, %v3840_v48 }
 0x117   : > { %3120 = vmatmul.f32.vlgmr.msrb.gmra.mxu0 %v3922_v6  ;;  %3245 = vmatpush.msra.mxu1 %v3244_v7 }
 0x118   : > { %v1485_v37 = vadd.f32 %v1484_v34, %v1461_v36  ;;  %3648 = vmatmul.msk.f32.vlgmr.msrb.gmra.mxu2 %vm175_vm0, %v3840_v48  ;;  %3649 = vmatmul.msk.f32.vlgmr.msrb.gmra.mxu3 %vm175_vm0, %v3840_v48 }
 0x119   : > { %3317 = vmatpush.msrb.mxu0 %v3242_v62 }
 0x11a   : > { %v1509_v38 = vadd.f32 %v1508_v35, %v1485_v37 }
 0x11b   : > { %v1530_v39 = vpop.f32.mrf.mxu1  ;;  %v1561_v40 = vpop.f32.mrf.mxu2 }
 0x11c   : > { %v1531_v30 = vadd.f32 %v1530_v39, %v1509_v38  ;;  %v1587_v32 = vpop.f32.mrf.mxu3  ;;  %v1611_v41 = vpop.f32.mrf.mxu0 }
 0x11d   : > { %v1588_v44 = vadd.f32 %v1587_v32, %v1561_v40 }
 0x11e   : > { %3144 = vmatmul.f32.vlgmr.msrb.gmra.mxu1 %v3926_v15 }
 0x11f   : > { %v1612_v20 = vadd.f32 %v1611_v41, %v1588_v44  ;;  %3221 = vmatmul.f32.vlgmr.msra.gmra.mxu0 %v3930_v23  ;;  %3339 = vmatpush.msrb.mxu1 %v4242_v52 }
 0x120   : > { %3271 = vmatmul.f32.vlgmr.msra.gmra.mxu2 %v3922_v6  ;;  %3295 = vmatmul.f32.vlgmr.msra.gmra.mxu3 %v3926_v15 }
 0x123   : > { %v1635_v46 = vpop.f32.mrf.mxu1  ;;  %v1659_v47 = vpop.f32.mrf.mxu2 }
 0x124   : > { %v1636_v33 = vadd.f32 %v1635_v46, %v1612_v20  ;;  %v1681_v24 = vpop.f32.mrf.mxu3  ;;  %v1712_v49 = vpop.f32.mrf.mxu0 }
 0x126   : > { %v1660_v50 = vadd.f32 %v1659_v47, %v1636_v33  ;;  %3650 = vmatmul.msk.f32.vlgmr.msra.gmra.mxu1 %vm175_vm0, %v3840_v48 }
 0x127   : > { %3651 = vmatmul.msk.f32.vlgmr.msrb.gmra.mxu0 %vm175_vm0, %v3840_v48 }
 0x128   : > { %v1682_v51 = vadd.f32 %v1681_v24, %v1660_v50 }
 0x12a   : > { %v3367_v23 = vrot.slane %v1682_v51, 7 }
 0x12b   : > { %v1738_v42 = vpop.f32.mrf.mxu1  ;;  %v1762_v52 = vpop.f32.mrf.mxu2 }
 0x12c   : > { %v4313_v6 = vsel %vm3387_vm1, %v1531_v30, %v3367_v23  ;;  %v1786_v15 = vpop.f32.mrf.mxu3  ;;  %v1810_v53 = vpop.f32.mrf.mxu0  ;;  %v1739_v9 = vadd.f32 %v1738_v42, %v1712_v49 }
 0x12e   : > { %3652 = vmatmul.msk.f32.vlgmr.msrb.gmra.mxu1 %vm175_vm0, %v3840_v48  ;;  %v1763_v11 = vadd.f32 %v1762_v52, %v1739_v9 }
 0x130   : > { %v1787_v21 = vadd.f32 %v1786_v15, %v1763_v11 }
 0x132   : > { %v1811_v31 = vadd.f32 %v1810_v53, %v1787_v21 }
 0x133   : > { %v1832_v54 = vpop.f32.mrf.mxu1  ;;  %v1863_v55 = vpop.f32.mrf.mxu2 }
 0x134   : > { %v1889_v57 = vpop.f32.mrf.mxu3  ;;  %v1913_v58 = vpop.f32.mrf.mxu0  ;;  %v1833_v41 = vadd.f32 %v1832_v54, %v1811_v31 }
 0x135   : > { %v1890_v10 = vadd.f32 %v1889_v57, %v1863_v55 }
 0x136   : > { %v3370_v24 = vrot.slane %v1833_v41, 6 }
 0x137   : > { %v1914_v5 = vadd.f32 %v1913_v58, %v1890_v10 }
 0x138   : > { %v3402_v54 = vsel %vm3389_vm2, %v4313_v6, %v3370_v24 }
 0x13b   : > { %v1937_v59 = vpop.f32.mrf.mxu1  ;;  %v1961_v25 = vpop.f32.mrf.mxu2 }
 0x13c   : > { %v1983_v60 = vpop.f32.mrf.mxu3  ;;  %v2014_v43 = vpop.f32.mrf.mxu0  ;;  %v1938_v27 = vadd.f32 %v1937_v59, %v1914_v5 }
 0x13e   : > { %v1962_v37 = vadd.f32 %v1961_v25, %v1938_v27 }
 0x140   : > { %v1984_v20 = vadd.f32 %v1983_v60, %v1962_v37 }
 0x142   : > { %v3373_v23 = vrot.slane %v1984_v20, 5 }
 0x143   : > { %v2040_v61 = vpop.f32.mrf.mxu1  ;;  %v2064_v56 = vpop.f32.mrf.mxu2 }
 0x144   : > { %v2088_v29 = vpop.f32.mrf.mxu3  ;;  %v2112_v63 = vpop.f32.mrf.mxu0  ;;  %v2041_v2 = vadd.f32 %v2040_v61, %v2014_v43  ;;  %v3403_v59 = vsel %vm3391_vm3, %v3402_v54, %v3373_v23 }
 0x146   : > { %v2065_v22 = vadd.f32 %v2064_v56, %v2041_v2 }
 0x148   : > { %v2089_v7 = vadd.f32 %v2088_v29, %v2065_v22 }
 0x14a   : > { %v2113_v40 = vadd.f32 %v2112_v63, %v2089_v7 }
 0x14b   : > { %v2134_v45 = vpop.f32.mrf.mxu1  ;;  %v2165_v0 = vpop.f32.mrf.mxu2 }
 0x14c   : > { %v2191_v1 = vpop.f32.mrf.mxu3  ;;  %v2215_v3 = vpop.f32.mrf.mxu0  ;;  %v2135_v46 = vadd.f32 %v2134_v45, %v2113_v40 }
 0x14d   : > { %v2192_v14 = vadd.f32 %v2191_v1, %v2165_v0 }
 0x14e   : > { %v3376_v53 = vrot.slane %v2135_v46, 4 }
 0x14f   : > { %v2216_v28 = vadd.f32 %v2215_v3, %v2192_v14 }
 0x150   : > { %v3404_v60 = vsel %vm3393_vm4, %v3403_v59, %v3376_v53 }
 0x153   : > { %v2239_v62 = vpop.f32.mrf.mxu1  ;;  %v2263_v4 = vpop.f32.mrf.mxu2 }
 0x154   : > { %v2285_v8 = vpop.f32.mrf.mxu3  ;;  %v2316_v48 = vpop.f32.mrf.mxu0  ;;  %v2240_v19 = vadd.f32 %v2239_v62, %v2216_v28 }
 0x156   : > { %v2264_v30 = vadd.f32 %v2263_v4, %v2240_v19 }
 0x158   : > { %v2286_v47 = vadd.f32 %v2285_v8, %v2264_v30 }
 0x15a   : > { %v3379_v55 = vrot.slane %v2286_v47, 3 }
 0x15b   : > { %v2342_v12 = vpop.f32.mrf.mxu1  ;;  %v2366_v13 = vpop.f32.mrf.mxu2 }
 0x15c   : > { %v2343_v16 = vadd.f32 %v2342_v12, %v2316_v48  ;;  %v2390_v17 = vpop.f32.mrf.mxu3  ;;  %v2414_v18 = vpop.f32.mrf.mxu0  ;;  %v3405_v43 = vsel %vm3395_vm5, %v3404_v60, %v3379_v55 }
 0x15e   : > { %v2367_v26 = vadd.f32 %v2366_v13, %v2343_v16 }
 0x160   : > { %v2391_v34 = vadd.f32 %v2390_v17, %v2367_v26 }
 0x162   : > { %v2415_v44 = vadd.f32 %v2414_v18, %v2391_v34 }
 0x163   : > { %v2436_v35 = vpop.f32.mrf.mxu1  ;;  %v2467_v36 = vpop.f32.mrf.mxu2 }
 0x164   : > { %v2493_v38 = vpop.f32.mrf.mxu3  ;;  %v2517_v39 = vpop.f32.mrf.mxu0  ;;  %v2437_v49 = vadd.f32 %v2436_v35, %v2415_v44 }
 0x165   : > { %v2494_v32 = vadd.f32 %v2493_v38, %v2467_v36 }
 0x166   : > { %v3382_v58 = vrot.slane %v2437_v49, 2 }
 0x167   : > { %v2518_v33 = vadd.f32 %v2517_v39, %v2494_v32 }
 0x168   : > { %v3406_v56 = vsel %vm3397_vm6, %v3405_v43, %v3382_v58 }
 0x16b   : > { %v2541_v50 = vpop.f32.mrf.mxu1  ;;  %v2565_v51 = vpop.f32.mrf.mxu2 }
 0x16c   : > { %v2542_v42 = vadd.f32 %v2541_v50, %v2518_v33  ;;  %v2587_v52 = vpop.f32.mrf.mxu3  ;;  %v2618_v15 = vpop.f32.mrf.mxu0 }
 0x16e   : > { %v2566_v57 = vadd.f32 %v2565_v51, %v2542_v42 }
 0x170   : > { %v2588_v25 = vadd.f32 %v2587_v52, %v2566_v57 }
 0x172   : > { %v3385_v61 = vrot.slane %v2588_v25, 1 }
 0x173   : > { %v2644_v29 = vpop.f32.mrf.mxu1  ;;  %v2668_v63 = vpop.f32.mrf.mxu2 }
 0x174   : > { %v3407_v45 = vsel %vm3399_vm7, %v3406_v56, %v3385_v61  ;;  %v2692_v0 = vpop.f32.mrf.mxu3  ;;  %v2716_v1 = vpop.f32.mrf.mxu0  ;;  %v2645_v27 = vadd.f32 %v2644_v29, %v2618_v15  ;;  %v3451_v29 = vld [vmem:[%s4289_s9] sm:$0xff] }
 0x175   : > { %3430 = vst.msk [vmem:[%s4289_s9 + $0x8] sm:$0xff] %vm3428_vm8, %v3407_v45  ;;  %v3455_v45 = vsel %vm3428_vm8, %v3451_v29, 0.0 }
 0x176   : > { %v2669_v38 = vadd.f32 %v2668_v63, %v2645_v27 }
 0x178   : > { %v2693_v32 = vadd.f32 %v2692_v0, %v2669_v38 }
 0x17a   : > { %v2717_v50 = vadd.f32 %v2716_v1, %v2693_v32 }
 0x17b   : > { %v2738_v6 = vpop.f32.mrf.mxu1  ;;  %v2769_v3 = vpop.f32.mrf.mxu2 }
 0x17c   : > { %v2795_v62 = vpop.f32.mrf.mxu3  ;;  %v2819_v4 = vpop.f32.mrf.mxu0  ;;  %v2739_v55 = vadd.f32 %v2738_v6, %v2717_v50  ;;  %v3452_v56 = vld [vmem:[%s4289_s9 + $0x8] sm:$0xff] }
 0x17d   : > { %v2796_v5 = vadd.f32 %v2795_v62, %v2769_v3  ;;  %v3456_v63 = vsel %vm3428_vm8, %v3452_v56, 0.0 }
 0x17e   : > { %v3457_v1 = vadd.f32 %v3456_v63, %v3455_v45 }
 0x17f   : > { %v2820_v28 = vadd.f32 %v2819_v4, %v2796_v5 }
 0x183   : > { %v2843_v8 = vpop.f32.mrf.mxu1  ;;  %v2867_v48 = vpop.f32.mrf.mxu2 }
 0x184   : > { %v2889_v9 = vpop.f32.mrf.mxu3  ;;  %v2920_v2 = vpop.f32.mrf.mxu0  ;;  %v2844_v34 = vadd.f32 %v2843_v8, %v2820_v28 }
 0x186   : > { %v2868_v40 = vadd.f32 %v2867_v48, %v2844_v34 }
 0x188   : > { %v2890_v47 = vadd.f32 %v2889_v9, %v2868_v40 }
 0x18a   : > { %v3409_v52 = vrot.slane %v2890_v47, 7 }
 0x18b   : > { %v2946_v10 = vpop.f32.mrf.mxu1  ;;  %v2970_v11 = vpop.f32.mrf.mxu2 }
 0x18c   : > { %v2994_v12 = vpop.f32.mrf.mxu3  ;;  %v3018_v13 = vpop.f32.mrf.mxu0  ;;  %v2947_v22 = vadd.f32 %v2946_v10, %v2920_v2  ;;  %v3420_v59 = vsel %vm3387_vm1, %v2739_v55, %v3409_v52 }
 0x18e   : > { %v2971_v26 = vadd.f32 %v2970_v11, %v2947_v22 }
 0x190   : > { %v2995_v37 = vadd.f32 %v2994_v12, %v2971_v26 }
 0x192   : > { %v3019_v30 = vadd.f32 %v3018_v13, %v2995_v37 }
 0x193   : > { %v3040_v14 = vpop.f32.mrf.mxu1  ;;  %v3071_v16 = vpop.f32.mrf.mxu2 }
 0x194   : > { %v3097_v17 = vpop.f32.mrf.mxu3  ;;  %v3121_v18 = vpop.f32.mrf.mxu0  ;;  %v3041_v24 = vadd.f32 %v3040_v14, %v3019_v30 }
 0x195   : > { %v3098_v21 = vadd.f32 %v3097_v17, %v3071_v16 }
 0x196   : > { %v3412_v15 = vrot.slane %v3041_v24, 6 }
 0x197   : > { %v3122_v35 = vadd.f32 %v3121_v18, %v3098_v21 }
 0x198   : > { %v3421_v25 = vsel %vm3389_vm2, %v3420_v59, %v3412_v15 }
 0x19b   : > { %v3145_v7 = vpop.f32.mrf.mxu1  ;;  %v3169_v19 = vpop.f32.mrf.mxu2 }
 0x19c   : > { %v3191_v31 = vpop.f32.mrf.mxu3  ;;  %v3222_v36 = vpop.f32.mrf.mxu0  ;;  %v3146_v39 = vadd.f32 %v3145_v7, %v3122_v35 }
 0x19e   : > { %v3170_v41 = vadd.f32 %v3169_v19, %v3146_v39 }
 0x1a0   : > { %v3192_v51 = vadd.f32 %v3191_v31, %v3170_v41 }
 0x1a2   : > { %v3415_v57 = vrot.slane %v3192_v51, 5 }
 0x1a3   : > { %v3248_v44 = vpop.f32.mrf.mxu1  ;;  %v3272_v20 = vpop.f32.mrf.mxu2 }
 0x1a4   : > { %v3249_v46 = vadd.f32 %v3248_v44, %v3222_v36  ;;  %v3296_v33 = vpop.f32.mrf.mxu3  ;;  %v3320_v23 = vpop.f32.mrf.mxu0  ;;  %v3422_v43 = vsel %vm3391_vm3, %v3421_v25, %v3415_v57 }
 0x1a6   : > { %v3273_v49 = vadd.f32 %v3272_v20, %v3249_v46 }
 0x1a8   : > { %v3297_v42 = vadd.f32 %v3296_v33, %v3273_v49 }
 0x1aa   : > { %v3321_v53 = vadd.f32 %v3320_v23, %v3297_v42 }
 0x1ab   : > { %v3342_v54 = vpop.f32.mrf.mxu1 }
 0x1ac   : > { %v3343_v58 = vadd.f32 %v3342_v54, %v3321_v53 }
 0x1ae   : > { %v3418_v60 = vrot.slane %v3343_v58, 4 }
 0x1b0   : > { %v3423_v61 = vsel %vm3393_vm4, %v3422_v43, %v3418_v60 }
 0x1b1   : > { %3432 = vst.msk [vmem:[%s4289_s9 + $0x10] sm:$0x1f] %vm3431_vm9, %v3423_v61 }
 0x1b8   : > { %v3453_v0 = vld [vmem:[%s4289_s9 + $0x10] sm:$0x1f] }
 0x1b9   : > { %v3459_v6 = vsel %vm3431_vm9, %v3453_v0, 0.0 }
 0x1ba   : > { %v3460_v3 = vadd.f32 %v3459_v6, %v3457_v1 }
 0x1bc   : > { %v3461_v62 = vrot.slane %v3460_v3, 4 }
 0x1be   : > { %v3462_v4 = vadd.f32 %v3461_v62, %v3460_v3 }
 0x1c0   : > { %v3463_v8 = vrot.slane %v3462_v4, 2 }
 0x1c2   : > { %v3464_v48 = vadd.f32 %v3463_v8, %v3462_v4 }
 0x1c4   : > { %v3465_v9 = vrot.slane %v3464_v48, 1 }
 0x1c6   : > { %v3466_v2 = vadd.f32 %v3465_v9, %v3464_v48 }
 0x1c8   : > { %3755 = vrcp.f32 %v3466_v2  ;;  %v3478_v13 = vand.u32 2147483648, %v3466_v2  ;;  %v3476_v16 = vand.u32 2147483647, %v3466_v2  ;;  %vm3472_vm11 = vweird.f32 %v3466_v2 }
 0x1ca   : > { %v3479_v18 = vor.u32 1.1754944e-38, %v3478_v13  ;;  %vm3477_vm13 = vcmp.eq.f32.partialorder %v3476_v16, 8.507059e+37 }
 0x1ce   : > { %v3756_v10 = vpop.eup %3755 }
 0x1cf   : > { %v3468_v11 = vmul.f32 %v3756_v10, %v3466_v2  ;;  %vm3473_vm10 = vweird.f32 %v3756_v10 }
 0x1d0   : > { %vm3474_vm12 = vmor %vm3472_vm11, %vm3473_vm10 }
 0x1d1   : > { %v3469_v12 = vsub.f32 1.0, %v3468_v11 }
 0x1d3   : > { %v3470_v14 = vmul.f32 %v3756_v10, %v3469_v12 }
 0x1d5   : > { %v3471_v17 = vadd.f32 %v3756_v10, %v3470_v14 }
 0x1d7   : > { %v3475_v22 = vsel %vm3474_vm12, %v3756_v10, %v3471_v17 }
 0x1d8   : > { %v3480_v5 = vsel %vm3477_vm13, %v3479_v18, %v3475_v22 }
 0x1d9   : > { %v3481_v21 = vmul.f32 %v3480_v5, %v3451_v29  ;;  %v3482_v26 = vmul.f32 %v3480_v5, %v3452_v56  ;;  %v3483_v27 = vmul.f32 %v3480_v5, %v3453_v0 }
 0x1db   : > { %3484 = vst.msk [vmem:[%s4289_s9] sm:$0xff] %vm3428_vm8, %v3481_v21 }
 0x1dc   : > { %3485 = vst.msk [vmem:[%s4289_s9 + $0x8] sm:$0xff] %vm3428_vm8, %v3482_v26 }
 0x1dd   : > { %3486 = vst.msk [vmem:[%s4289_s9 + $0x10] sm:$0x1f] %vm3431_vm9, %v3483_v27 }
 0x1de PF: > { %s14_s11 = sadd.s32 1, %s3837_s11   ;;  %s4366_s6 = smov %s3821_s7 }
 0x1df   : > { %p11_p0 = scmp.ge.s32.totalorder %s14_s11, 4   ;;  %s4367_s7 = smov %s3825_s8 }
 0x1e0   : > { %s4368_s8 = smov %s3900_s18  ;;  %s4369_s9 = smov %s3833_s10 }
 0x1e1   : > { %s4370_s10 = smov %s4372_s13  ;;  %13 = sbr.rel (!%p11_p0) target bundleno = 4 (0x4), region = 76 }
 0x1e6   :  { %3514 = vsyncpa [#allocation3], 1 }
 0x1e7   :  { %3516 = vsyncpa [#allocation3 + $0x1], 1 }

</bundles_post_ra>
